<compile_context>
chip_gen: v7x
topology: tpu7x:2x2x1
jax: 0.10.0
libtpu: 0.0.40
codegen_flags: <defaults>
</compile_context>

<pallas_src>
import functools

import jax
import jax.numpy as jnp
from jax import lax
from jax.experimental import pallas as pl
from jax.experimental.pallas import tpu as pltpu
import numpy as np


def ghcf_gln_kernel(z_ref, e_ref, wvec_t_ref, wmat_ref, wedge_ref,
                    zo_ref, eo_ref, *, num_user):
    """Whole forward in one grid step (small graphs fit in VMEM).

    z_ref      : (U+I, D) concat of src_feature (user_emb*0.1) and dst_feature
    e_ref      : (1, D)   edge feature (buy_edges_emb * 0.1)
    wvec_t_ref : (D, 12)  permuted projection vectors, pre-transposed
    wmat_ref   : (12,D,D) permuted square weights with (MTL_w * 0.5) pre-folded
    wedge_ref  : (D, 3*D) stacked edge transforms, (W + I)/2 pre-folded
    zo_ref     : (U+I, D) new user features (rows < U) and item features (rows >= U)
    eo_ref     : (1, 3*D) new edge features [buy | cart | pv]
    """
    z = z_ref[...]                       # (R, D), R = U + I
    e = e_ref[...]                       # (1, D)

    # Single fused projection for users and items: (R, D) @ (D, 12).
    ze = z * e                           # edge broadcasts over rows
    proj = jnp.dot(ze, wvec_t_ref[...], preferred_element_type=jnp.float32)  # (R, 12)

    R, K = proj.shape                    # R = U+I, K = 12
    row = lax.broadcasted_iota(jnp.int32, (R, K), 0)
    col = lax.broadcasted_iota(jnp.int32, (R, K), 1)
    is_user_row = row < num_user

    # Row-sum source mask: even permuted columns contract against user rows (x),
    # odd permuted columns against item rows (y).
    s_mask = ((col % 2) == 0) == is_user_row
    proj_s = jnp.where(s_mask, proj, 0.0)

    # Combine-coefficient mask: columns 0..5 build user rows, 6..11 build item rows.
    c_mask = (col < (K // 2)) == is_user_row
    coeff = jnp.where(c_mask, proj, 0.0)

    # S[k, :] = sum_r proj_s[r, k] * z[r, :]   -> (12, D)   (one MXU matmul)
    s = lax.dot_general(proj_s, z, (((0,), (0,)), ((), ())),
                        preferred_element_type=jnp.float32)

    # V[k, :] = S[k, :] @ wmat_s[k]            -> (12, D)   (12 vector-matrix ops)
    v_rows = [
        jnp.dot(s[k:k + 1, :], wmat_ref[k], preferred_element_type=jnp.float32)
        for k in range(K)
    ]
    v = jnp.concatenate(v_rows, axis=0)       # (12, D)

    # z_acc = coeff @ V  rebuilds all six rank-1 terms per row in one matmul.
    z_acc = jnp.dot(coeff, v, preferred_element_type=jnp.float32)   # (R, D)
    zo_ref[...] = (z_acc + z) * 0.5

    # Edge update: (e @ W_t + e)/2 for buy/cart/pv, residual folded into wedge_ref.
    eo_ref[...] = jnp.dot(e, wedge_ref[...], preferred_element_type=jnp.float32)


def ghcf_gln_forward(src_feat, dst_feat, edge_feat, wvec, wmat, wedge, mtl_w):
    """Wrapper: permutes/folds params on the host, calls pallas_call once."""
    U, D = src_feat.shape
    I = dst_feat.shape[0]

    # Permutation of the 12 behavior/side indices (see module docstring).
    perm = np.array([0, 1, 4, 5, 8, 9, 2, 3, 6, 7, 10, 11], dtype=np.int32)
    wb, wc, wp = mtl_w['buy'], mtl_w['cart'], mtl_w['pv']
    scale = jnp.array([wb, wb, wc, wc, wp, wp] * 2, dtype=jnp.float32) * 0.5

    wvec_t = jnp.transpose(wvec[perm], (1, 0))                 # (D, 12)
    wmat_s = wmat[perm] * scale[:, None, None]                 # (12, D, D)
    eye = jnp.eye(D, dtype=jnp.float32)
    wedge_cat = jnp.concatenate(
        [(wedge[t] + eye) * 0.5 for t in range(3)], axis=1)    # (D, 3*D)

    z = jnp.concatenate([src_feat, dst_feat], axis=0)          # (U+I, D)

    kernel = functools.partial(ghcf_gln_kernel, num_user=U)
    vmem = pl.BlockSpec(memory_space=pltpu.MemorySpace.VMEM)
    zo, eo = pl.pallas_call(
        kernel,
        out_shape=(
            jax.ShapeDtypeStruct((U + I, D), jnp.float32),
            jax.ShapeDtypeStruct((1, 3 * D), jnp.float32),
        ),
        in_specs=[vmem] * 5,
        out_specs=(vmem, vmem),
    )(z, edge_feat, wvec_t, wmat_s, wedge_cat)

    x_out = zo[:U]
    y_out = zo[U:]
    # TODO(synk): if this layer is called repeatedly, keep wmat_s/wedge_cat resident
    # across calls (weight DMA ~1 MiB dominates this kernel) instead of re-streaming.
    return x_out, y_out, eo[:, 0:D], eo[:, D:2 * D], eo[:, 2 * D:3 * D]


def ref_forward(src_feat, dst_feat, edge_feat, wvec, wmat, wedge, mtl_w):
    """Pure-JAX mirror of the PyTorch forward (explicit outer products)."""
    x, y, e = src_feat, dst_feat, edge_feat
    x_acc = jnp.zeros_like(x)
    y_acc = jnp.zeros_like(y)
    for t, wt in enumerate((mtl_w['buy'], mtl_w['cart'], mtl_w['pv'])):
        uu, ui, iu, ii = 4 * t + 0, 4 * t + 1, 4 * t + 2, 4 * t + 3
        x_xx = (x * e) @ wvec[uu]
        x_xyx = (x * e) @ wvec[ui]
        x_xyy = (y * e) @ wvec[ui]
        y_yy = (y * e) @ wvec[ii]
        y_yxx = (y * e) @ wvec[iu]
        y_yxy = (x * e) @ wvec[iu]
        x1 = (jnp.outer(x_xx, x_xx) @ x) @ wmat[uu]
        x2 = (jnp.outer(x_xyx, x_xyy) @ y) @ wmat[ui]
        y1 = (jnp.outer(y_yy, y_yy) @ y) @ wmat[ii]
        y2 = (jnp.outer(y_yxx, y_yxy) @ x) @ wmat[iu]
        x_acc = x_acc + wt * (x1 + x2) / 2
        y_acc = y_acc + wt * (y1 + y2) / 2
    x_out = (x_acc + x) / 2
    y_out = (y_acc + y) / 2
    edges = [((e @ wedge[t]) + e) / 2 for t in range(3)]
    return x_out, y_out, edges[0], edges[1], edges[2]


if __name__ == "__main__":
    num_user, num_item, emb_dim = 16, 24, 128
    mtl_w = {'buy': 0.5, 'cart': 1.0 / 3.0, 'pv': 1.0 / 6.0}

    key = jax.random.PRNGKey(0)
    ks = jax.random.split(key, 6)
    user_emb = jax.random.normal(ks[0], (num_user, emb_dim), jnp.float32)
    item_emb = jax.random.normal(ks[1], (num_item, emb_dim), jnp.float32)
    buy_edges_emb = jax.random.normal(ks[2], (1, emb_dim), jnp.float32)
    # 12 vector weights (randn/10), stacked [buy_uu, buy_ui, buy_iu, buy_ii, cart_*, pv_*]
    wvec = jax.random.normal(ks[3], (12, emb_dim), jnp.float32) / 10.0
    # 12 square weights (randn/10), same stacking order
    wmat = jax.random.normal(ks[4], (12, emb_dim, emb_dim), jnp.float32) / 10.0
    # 3 edge-transform weights (buy, cart, pv)
    wedge = jax.random.normal(ks[5], (3, emb_dim, emb_dim), jnp.float32) / 10.0

    a = 0.1
    b = 0.1
    src_feat = user_emb * a                      # g['buy'].nodes('user') -> all users
    dst_feat = item_emb * a                      # g['buy'].nodes('item') -> all items
    edge_feat = buy_edges_emb * b                # edge_buy == edge_cart == edge_pv

    outs = ghcf_gln_forward(src_feat, dst_feat, edge_feat, wvec, wmat, wedge, mtl_w)
    outs = jax.block_until_ready(outs)

    refs = ref_forward(src_feat, dst_feat, edge_feat, wvec, wmat, wedge, mtl_w)
    refs = jax.block_until_ready(refs)

    for o, r in zip(outs, refs):
        np.testing.assert_allclose(np.asarray(o), np.asarray(r), rtol=1e-4, atol=1e-6)

    print("KERNEL_OK")
</pallas_src>

<mosaic_0001>
module attributes {stable_mosaic.version = 11 : i64} {
  func.func @ghcf_gln_kernel(%arg0: memref<40x128xf32, #tpu.memory_space<vmem>>, %arg1: memref<1x128xf32, #tpu.memory_space<vmem>>, %arg2: memref<128x12xf32, #tpu.memory_space<vmem>>, %arg3: memref<12x128x128xf32, #tpu.memory_space<vmem>>, %arg4: memref<128x384xf32, #tpu.memory_space<vmem>>, %arg5: memref<40x128xf32, #tpu.memory_space<vmem>>, %arg6: memref<1x384xf32, #tpu.memory_space<vmem>>) attributes {dimension_semantics = [], scalar_prefetch = 0 : i64, scratch_operands = 0 : i64, tpu.core_type = #tpu.core_type<tc>} {
    %c0 = arith.constant 0 : index
    %c0_0 = arith.constant 0 : index
    %0 = vector.load %arg0[%c0, %c0_0] : memref<40x128xf32, #tpu.memory_space<vmem>>, vector<40x128xf32>
    %c0_1 = arith.constant 0 : index
    %c0_2 = arith.constant 0 : index
    %1 = vector.load %arg1[%c0_1, %c0_2] : memref<1x128xf32, #tpu.memory_space<vmem>>, vector<1x128xf32>
    %2 = vector.broadcast %1 : vector<1x128xf32> to vector<40x128xf32>
    %3 = arith.mulf %0, %2 : vector<40x128xf32>
    %c0_3 = arith.constant 0 : index
    %c0_4 = arith.constant 0 : index
    %4 = vector.load %arg2[%c0_3, %c0_4] : memref<128x12xf32, #tpu.memory_space<vmem>>, vector<128x12xf32>
    %cst = arith.constant dense<0.000000e+00> : vector<40x12xf32>
    %5 = tpu.matmul %3, %4, %cst {dimension_numbers = #tpu.dot_dimension_numbers<[1], [0], [0], [1], [0, 0, 1, 1], [], []>} : vector<40x128xf32>, vector<128x12xf32>, vector<40x12xf32> -> vector<40x12xf32>
    %6 = tpu.iota {dimensions = array<i32: 0>} : vector<40x12xi32>
    %7 = tpu.iota {dimensions = array<i32: 1>} : vector<40x12xi32>
    %c16_i32 = arith.constant 16 : i32
    %8 = vector.broadcast %c16_i32 : i32 to vector<40x12xi32>
    %9 = arith.cmpi slt, %6, %8 : vector<40x12xi32>
    %c2_i32 = arith.constant 2 : i32
    %c0_i32 = arith.constant 0 : i32
    %10 = arith.cmpi eq, %c2_i32, %c0_i32 : i32
    %c1_i32 = arith.constant 1 : i32
    %11 = arith.select %10, %c1_i32, %c2_i32 : i32
    %12 = vector.broadcast %11 : i32 to vector<40x12xi32>
    %13 = arith.remsi %7, %12 : vector<40x12xi32>
    %c0_i32_5 = arith.constant 0 : i32
    %14 = vector.broadcast %c0_i32_5 : i32 to vector<40x12xi32>
    %15 = arith.cmpi ne, %13, %14 : vector<40x12xi32>
    %c0_i32_6 = arith.constant 0 : i32
    %16 = vector.broadcast %c0_i32_6 : i32 to vector<40x12xi32>
    %17 = arith.cmpi slt, %13, %16 : vector<40x12xi32>
    %c0_i32_7 = arith.constant 0 : i32
    %18 = arith.cmpi slt, %11, %c0_i32_7 : i32
    %19 = vector.broadcast %18 : i1 to vector<40x12xi1>
    %20 = vector.broadcast %19 : vector<40x12xi1> to vector<40x12xi1>
    %21 = arith.xori %17, %20 : vector<40x12xi1>
    %22 = arith.andi %21, %15 : vector<40x12xi1>
    %23 = vector.broadcast %11 : i32 to vector<40x12xi32>
    %24 = arith.addi %13, %23 : vector<40x12xi32>
    %25 = arith.select %22, %24, %13 : vector<40x12xi1>, vector<40x12xi32>
    %c0_i32_8 = arith.constant 0 : i32
    %26 = vector.broadcast %c0_i32_8 : i32 to vector<40x12xi32>
    %27 = arith.cmpi eq, %25, %26 : vector<40x12xi32>
    %28 = arith.xori %27, %9 : vector<40x12xi1>
    %cst_9 = arith.constant dense<true> : vector<40x12xi1>
    %29 = arith.xori %28, %cst_9 : vector<40x12xi1>
    %cst_10 = arith.constant 0.000000e+00 : f32
    %30 = vector.broadcast %cst_10 : f32 to vector<40x12xf32>
    %31 = arith.select %29, %5, %30 : vector<40x12xi1>, vector<40x12xf32>
    %c6_i32 = arith.constant 6 : i32
    %32 = vector.broadcast %c6_i32 : i32 to vector<40x12xi32>
    %33 = arith.cmpi slt, %7, %32 : vector<40x12xi32>
    %34 = arith.xori %33, %9 : vector<40x12xi1>
    %cst_11 = arith.constant dense<true> : vector<40x12xi1>
    %35 = arith.xori %34, %cst_11 : vector<40x12xi1>
    %cst_12 = arith.constant 0.000000e+00 : f32
    %36 = vector.broadcast %cst_12 : f32 to vector<40x12xf32>
    %37 = arith.select %35, %5, %36 : vector<40x12xi1>, vector<40x12xf32>
    %cst_13 = arith.constant dense<0.000000e+00> : vector<12x128xf32>
    %38 = tpu.matmul %31, %0, %cst_13 {dimension_numbers = #tpu.dot_dimension_numbers<[0], [0], [1], [1], [0, 1, 1, 1], [], []>} : vector<40x12xf32>, vector<40x128xf32>, vector<12x128xf32> -> vector<12x128xf32>
    %39 = vector.extract_strided_slice %38 {offsets = [0, 0], sizes = [1, 128], strides = [1, 1]} : vector<12x128xf32> to vector<1x128xf32>
    %c0_14 = arith.constant 0 : index
    %c0_15 = arith.constant 0 : index
    %c0_16 = arith.constant 0 : index
    %40 = vector.load %arg3[%c0_14, %c0_15, %c0_16] : memref<12x128x128xf32, #tpu.memory_space<vmem>>, vector<1x128x128xf32>
    %41 = vector.shape_cast %40 : vector<1x128x128xf32> to vector<128x128xf32>
    %cst_17 = arith.constant dense<0.000000e+00> : vector<1x128xf32>
    %42 = tpu.matmul %39, %41, %cst_17 {dimension_numbers = #tpu.dot_dimension_numbers<[1], [0], [0], [1], [0, 0, 1, 1], [], []>} : vector<1x128xf32>, vector<128x128xf32>, vector<1x128xf32> -> vector<1x128xf32>
    %43 = vector.extract_strided_slice %38 {offsets = [1, 0], sizes = [1, 128], strides = [1, 1]} : vector<12x128xf32> to vector<1x128xf32>
    %c1 = arith.constant 1 : index
    %c0_18 = arith.constant 0 : index
    %c0_19 = arith.constant 0 : index
    %44 = vector.load %arg3[%c1, %c0_18, %c0_19] : memref<12x128x128xf32, #tpu.memory_space<vmem>>, vector<1x128x128xf32>
    %45 = vector.shape_cast %44 : vector<1x128x128xf32> to vector<128x128xf32>
    %cst_20 = arith.constant dense<0.000000e+00> : vector<1x128xf32>
    %46 = tpu.matmul %43, %45, %cst_20 {dimension_numbers = #tpu.dot_dimension_numbers<[1], [0], [0], [1], [0, 0, 1, 1], [], []>} : vector<1x128xf32>, vector<128x128xf32>, vector<1x128xf32> -> vector<1x128xf32>
    %47 = vector.extract_strided_slice %38 {offsets = [2, 0], sizes = [1, 128], strides = [1, 1]} : vector<12x128xf32> to vector<1x128xf32>
    %c2 = arith.constant 2 : index
    %c0_21 = arith.constant 0 : index
    %c0_22 = arith.constant 0 : index
    %48 = vector.load %arg3[%c2, %c0_21, %c0_22] : memref<12x128x128xf32, #tpu.memory_space<vmem>>, vector<1x128x128xf32>
    %49 = vector.shape_cast %48 : vector<1x128x128xf32> to vector<128x128xf32>
    %cst_23 = arith.constant dense<0.000000e+00> : vector<1x128xf32>
    %50 = tpu.matmul %47, %49, %cst_23 {dimension_numbers = #tpu.dot_dimension_numbers<[1], [0], [0], [1], [0, 0, 1, 1], [], []>} : vector<1x128xf32>, vector<128x128xf32>, vector<1x128xf32> -> vector<1x128xf32>
    %51 = vector.extract_strided_slice %38 {offsets = [3, 0], sizes = [1, 128], strides = [1, 1]} : vector<12x128xf32> to vector<1x128xf32>
    %c3 = arith.constant 3 : index
    %c0_24 = arith.constant 0 : index
    %c0_25 = arith.constant 0 : index
    %52 = vector.load %arg3[%c3, %c0_24, %c0_25] : memref<12x128x128xf32, #tpu.memory_space<vmem>>, vector<1x128x128xf32>
    %53 = vector.shape_cast %52 : vector<1x128x128xf32> to vector<128x128xf32>
    %cst_26 = arith.constant dense<0.000000e+00> : vector<1x128xf32>
    %54 = tpu.matmul %51, %53, %cst_26 {dimension_numbers = #tpu.dot_dimension_numbers<[1], [0], [0], [1], [0, 0, 1, 1], [], []>} : vector<1x128xf32>, vector<128x128xf32>, vector<1x128xf32> -> vector<1x128xf32>
    %55 = vector.extract_strided_slice %38 {offsets = [4, 0], sizes = [1, 128], strides = [1, 1]} : vector<12x128xf32> to vector<1x128xf32>
    %c4 = arith.constant 4 : index
    %c0_27 = arith.constant 0 : index
    %c0_28 = arith.constant 0 : index
    %56 = vector.load %arg3[%c4, %c0_27, %c0_28] : memref<12x128x128xf32, #tpu.memory_space<vmem>>, vector<1x128x128xf32>
    %57 = vector.shape_cast %56 : vector<1x128x128xf32> to vector<128x128xf32>
    %cst_29 = arith.constant dense<0.000000e+00> : vector<1x128xf32>
    %58 = tpu.matmul %55, %57, %cst_29 {dimension_numbers = #tpu.dot_dimension_numbers<[1], [0], [0], [1], [0, 0, 1, 1], [], []>} : vector<1x128xf32>, vector<128x128xf32>, vector<1x128xf32> -> vector<1x128xf32>
    %59 = vector.extract_strided_slice %38 {offsets = [5, 0], sizes = [1, 128], strides = [1, 1]} : vector<12x128xf32> to vector<1x128xf32>
    %c5 = arith.constant 5 : index
    %c0_30 = arith.constant 0 : index
    %c0_31 = arith.constant 0 : index
    %60 = vector.load %arg3[%c5, %c0_30, %c0_31] : memref<12x128x128xf32, #tpu.memory_space<vmem>>, vector<1x128x128xf32>
    %61 = vector.shape_cast %60 : vector<1x128x128xf32> to vector<128x128xf32>
    %cst_32 = arith.constant dense<0.000000e+00> : vector<1x128xf32>
    %62 = tpu.matmul %59, %61, %cst_32 {dimension_numbers = #tpu.dot_dimension_numbers<[1], [0], [0], [1], [0, 0, 1, 1], [], []>} : vector<1x128xf32>, vector<128x128xf32>, vector<1x128xf32> -> vector<1x128xf32>
    %63 = vector.extract_strided_slice %38 {offsets = [6, 0], sizes = [1, 128], strides = [1, 1]} : vector<12x128xf32> to vector<1x128xf32>
    %c6 = arith.constant 6 : index
    %c0_33 = arith.constant 0 : index
    %c0_34 = arith.constant 0 : index
    %64 = vector.load %arg3[%c6, %c0_33, %c0_34] : memref<12x128x128xf32, #tpu.memory_space<vmem>>, vector<1x128x128xf32>
    %65 = vector.shape_cast %64 : vector<1x128x128xf32> to vector<128x128xf32>
    %cst_35 = arith.constant dense<0.000000e+00> : vector<1x128xf32>
    %66 = tpu.matmul %63, %65, %cst_35 {dimension_numbers = #tpu.dot_dimension_numbers<[1], [0], [0], [1], [0, 0, 1, 1], [], []>} : vector<1x128xf32>, vector<128x128xf32>, vector<1x128xf32> -> vector<1x128xf32>
    %67 = vector.extract_strided_slice %38 {offsets = [7, 0], sizes = [1, 128], strides = [1, 1]} : vector<12x128xf32> to vector<1x128xf32>
    %c7 = arith.constant 7 : index
    %c0_36 = arith.constant 0 : index
    %c0_37 = arith.constant 0 : index
    %68 = vector.load %arg3[%c7, %c0_36, %c0_37] : memref<12x128x128xf32, #tpu.memory_space<vmem>>, vector<1x128x128xf32>
    %69 = vector.shape_cast %68 : vector<1x128x128xf32> to vector<128x128xf32>
    %cst_38 = arith.constant dense<0.000000e+00> : vector<1x128xf32>
    %70 = tpu.matmul %67, %69, %cst_38 {dimension_numbers = #tpu.dot_dimension_numbers<[1], [0], [0], [1], [0, 0, 1, 1], [], []>} : vector<1x128xf32>, vector<128x128xf32>, vector<1x128xf32> -> vector<1x128xf32>
    %71 = vector.extract_strided_slice %38 {offsets = [8, 0], sizes = [1, 128], strides = [1, 1]} : vector<12x128xf32> to vector<1x128xf32>
    %c8 = arith.constant 8 : index
    %c0_39 = arith.constant 0 : index
    %c0_40 = arith.constant 0 : index
    %72 = vector.load %arg3[%c8, %c0_39, %c0_40] : memref<12x128x128xf32, #tpu.memory_space<vmem>>, vector<1x128x128xf32>
    %73 = vector.shape_cast %72 : vector<1x128x128xf32> to vector<128x128xf32>
    %cst_41 = arith.constant dense<0.000000e+00> : vector<1x128xf32>
    %74 = tpu.matmul %71, %73, %cst_41 {dimension_numbers = #tpu.dot_dimension_numbers<[1], [0], [0], [1], [0, 0, 1, 1], [], []>} : vector<1x128xf32>, vector<128x128xf32>, vector<1x128xf32> -> vector<1x128xf32>
    %75 = vector.extract_strided_slice %38 {offsets = [9, 0], sizes = [1, 128], strides = [1, 1]} : vector<12x128xf32> to vector<1x128xf32>
    %c9 = arith.constant 9 : index
    %c0_42 = arith.constant 0 : index
    %c0_43 = arith.constant 0 : index
    %76 = vector.load %arg3[%c9, %c0_42, %c0_43] : memref<12x128x128xf32, #tpu.memory_space<vmem>>, vector<1x128x128xf32>
    %77 = vector.shape_cast %76 : vector<1x128x128xf32> to vector<128x128xf32>
    %cst_44 = arith.constant dense<0.000000e+00> : vector<1x128xf32>
    %78 = tpu.matmul %75, %77, %cst_44 {dimension_numbers = #tpu.dot_dimension_numbers<[1], [0], [0], [1], [0, 0, 1, 1], [], []>} : vector<1x128xf32>, vector<128x128xf32>, vector<1x128xf32> -> vector<1x128xf32>
    %79 = vector.extract_strided_slice %38 {offsets = [10, 0], sizes = [1, 128], strides = [1, 1]} : vector<12x128xf32> to vector<1x128xf32>
    %c10 = arith.constant 10 : index
    %c0_45 = arith.constant 0 : index
    %c0_46 = arith.constant 0 : index
    %80 = vector.load %arg3[%c10, %c0_45, %c0_46] : memref<12x128x128xf32, #tpu.memory_space<vmem>>, vector<1x128x128xf32>
    %81 = vector.shape_cast %80 : vector<1x128x128xf32> to vector<128x128xf32>
    %cst_47 = arith.constant dense<0.000000e+00> : vector<1x128xf32>
    %82 = tpu.matmul %79, %81, %cst_47 {dimension_numbers = #tpu.dot_dimension_numbers<[1], [0], [0], [1], [0, 0, 1, 1], [], []>} : vector<1x128xf32>, vector<128x128xf32>, vector<1x128xf32> -> vector<1x128xf32>
    %83 = vector.extract_strided_slice %38 {offsets = [11, 0], sizes = [1, 128], strides = [1, 1]} : vector<12x128xf32> to vector<1x128xf32>
    %c11 = arith.constant 11 : index
    %c0_48 = arith.constant 0 : index
    %c0_49 = arith.constant 0 : index
    %84 = vector.load %arg3[%c11, %c0_48, %c0_49] : memref<12x128x128xf32, #tpu.memory_space<vmem>>, vector<1x128x128xf32>
    %85 = vector.shape_cast %84 : vector<1x128x128xf32> to vector<128x128xf32>
    %cst_50 = arith.constant dense<0.000000e+00> : vector<1x128xf32>
    %86 = tpu.matmul %83, %85, %cst_50 {dimension_numbers = #tpu.dot_dimension_numbers<[1], [0], [0], [1], [0, 0, 1, 1], [], []>} : vector<1x128xf32>, vector<128x128xf32>, vector<1x128xf32> -> vector<1x128xf32>
    %87 = tpu.concatenate %42, %46, %50, %54, %58, %62, %66, %70, %74, %78, %82, %86 in 0 : vector<1x128xf32>, vector<1x128xf32>, vector<1x128xf32>, vector<1x128xf32>, vector<1x128xf32>, vector<1x128xf32>, vector<1x128xf32>, vector<1x128xf32>, vector<1x128xf32>, vector<1x128xf32>, vector<1x128xf32>, vector<1x128xf32> -> vector<12x128xf32>
    %cst_51 = arith.constant dense<0.000000e+00> : vector<40x128xf32>
    %88 = tpu.matmul %37, %87, %cst_51 {dimension_numbers = #tpu.dot_dimension_numbers<[1], [0], [0], [1], [0, 0, 1, 1], [], []>} : vector<40x12xf32>, vector<12x128xf32>, vector<40x128xf32> -> vector<40x128xf32>
    %89 = arith.addf %88, %0 : vector<40x128xf32>
    %cst_52 = arith.constant 5.000000e-01 : f32
    %90 = vector.broadcast %cst_52 : f32 to vector<40x128xf32>
    %91 = arith.mulf %89, %90 : vector<40x128xf32>
    %c0_53 = arith.constant 0 : index
    %c0_54 = arith.constant 0 : index
    %92 = vector.load %arg5[%c0_53, %c0_54] : memref<40x128xf32, #tpu.memory_space<vmem>>, vector<40x128xf32>
    tpu.vector_store %arg5[%c0_53, %c0_54], %91 {strides = array<i32>} : memref<40x128xf32, #tpu.memory_space<vmem>>, vector<40x128xf32>,
    %c0_55 = arith.constant 0 : index
    %c0_56 = arith.constant 0 : index
    %93 = vector.load %arg4[%c0_55, %c0_56] : memref<128x384xf32, #tpu.memory_space<vmem>>, vector<128x384xf32>
    %cst_57 = arith.constant dense<0.000000e+00> : vector<1x384xf32>
    %94 = tpu.matmul %1, %93, %cst_57 {dimension_numbers = #tpu.dot_dimension_numbers<[1], [0], [0], [1], [0, 0, 1, 1], [], []>} : vector<1x128xf32>, vector<128x384xf32>, vector<1x384xf32> -> vector<1x384xf32>
    %c0_58 = arith.constant 0 : index
    %c0_59 = arith.constant 0 : index
    %95 = vector.load %arg6[%c0_58, %c0_59] : memref<1x384xf32, #tpu.memory_space<vmem>>, vector<1x384xf32>
    tpu.vector_store %arg6[%c0_58, %c0_59], %94 {strides = array<i32>} : memref<1x384xf32, #tpu.memory_space<vmem>>, vector<1x384xf32>,
    return
  }
}

</mosaic_0001>

<bundles_post_ra>
// kernel: tpu_custom_call.1
= control target key start
LH: loop header
LB: loop body
LE: loop exit
PB: predicated region body
PF: predicated region fallthrough
CT: control target
= control target key end

     0   :  { %12 = vsyncpa [#allocation3], 0  ;;  %s3586_s0 = inlined_call_operand.vmem [shape: f32[40,128], index: 0, kind: input, shape index: {}]   ;;  %s3587_s1 = inlined_call_operand.vmem [shape: f32[1,128], index: 1, kind: input, shape index: {}]   ;;  %s3588_s2 = inlined_call_operand.vmem [shape: f32[128,12], index: 2, kind: input, shape index: {}]   ;;  %s3589_s3 = inlined_call_operand.hbm [shape: f32[12,128,128], index: 3, kind: input, shape index: {}]   ;;  %s3590_s4 = inlined_call_operand.hbm [shape: f32[128,384], index: 4, kind: input, shape index: {}]   ;;  %s3591_s5 = inlined_call_operand.hbm [shape: f32[40,128], index: 5, kind: output, shape index: {0}]   ;;  %s3592_s6 = inlined_call_operand.hbm [shape: f32[1,384], index: 6, kind: output, shape index: {1}]  }
   0x1   :  { %13 = vsyncpa [#allocation6], 0 }
   0x2   :  { %14 = vsyncpa [#allocation4], 0 }
   0x3   :  { %15 = vsyncpa [#allocation9], 0  ;;  %s3124_s21 = smov [#allocation2]   ;;  %s3028_s25 = scalar_lea.hbm %s3589_s3, 24576 }
   0x4   :  { %s27_s22 = sshll.u32 %s3124_s21, 4  ;;  %p3029_p0 = scmp.ne.s32.totalorder %s3589_s3, %s3028_s25  ;;  %s28_s22 = int_to_ptr.vmem [resolvable:$true] %s27_s22 }
   0x5   :  { %p3032_p1 = scmp.lt.u32.totalorder %s3028_s25, %s3589_s3 }
   0x7   :  { %p3034_p2 = pnand %p3032_p1, %p3029_p0 }
   0x9   :  { %3037 = shalt.err (!%p3034_p2)
}
   0xa   :  { %s3038_s30 = scalar_lea.vmem %s28_s22, 24576  ;;  %p3043_p4 = scmp.lt.s32.totalorder %s28_s22, %s28_s22 }
   0xb   :  { %p3039_p3 = scmp.ne.s32.totalorder %s28_s22, %s3038_s30  ;;  %p3044_p5 = scmp.lt.s32.totalorder %s3038_s30, %s3038_s30 }
   0xd   :  { %p3045_p6 = por %p3044_p5, %p3043_p4 }
   0xf   :  { %p3046_p7 = pnand %p3045_p6, %p3039_p3 }
  0x11   :  { %3049 = shalt.err (!%p3046_p7)
}
  0x12   :  { %s3125_s7 = smov 128   ;;  %s3126_s8 = smov 8  }
  0x13   :  { %33 = dma.hbm_to_vmem [thread:$0]  %s3589_s3, 24576, %s28_s22, [#allocation3], %s3125_s7, %s3125_s7, %s3126_s8  }
  0x14   :  { %s3127_s11 = smov [#allocation5]   ;;  %s3050_s15 = scalar_lea.hbm %s3590_s4, 6144 }
  0x15   :  { %s39_s12 = sshll.u32 %s3127_s11, 4  ;;  %p3051_p8 = scmp.ne.s32.totalorder %s3590_s4, %s3050_s15  ;;  %s40_s12 = int_to_ptr.vmem [resolvable:$true] %s39_s12 }
  0x16   :  { %p3054_p9 = scmp.lt.u32.totalorder %s3050_s15, %s3590_s4 }
  0x18   :  { %p3056_p10 = pnand %p3054_p9, %p3051_p8 }
  0x1a   :  { %3059 = shalt.err (!%p3056_p10)
}
  0x1b   :  { %s3060_s20 = scalar_lea.vmem %s40_s12, 6144  ;;  %p3065_p12 = scmp.lt.s32.totalorder %s40_s12, %s40_s12 }
  0x1c   :  { %p3061_p11 = scmp.ne.s32.totalorder %s40_s12, %s3060_s20  ;;  %p3066_p13 = scmp.lt.s32.totalorder %s3060_s20, %s3060_s20 }
  0x1e   :  { %p3067_p0 = por %p3066_p13, %p3065_p12 }
  0x20   :  { %p3068_p1 = pnand %p3067_p0, %p3061_p11 }
  0x22   :  { %3071 = shalt.err (!%p3068_p1)
}
  0x23   :  { %s3128_s3 = smov 384   ;;  %s3129_s21 = smov 24  }
  0x24   :  { %45 = dma.hbm_to_vmem [thread:$0]  %s3590_s4, 6144, %s40_s12, [#allocation6], %s3128_s3, %s3128_s3, %s3129_s21  }
  0x25   :  { %3116 = dma.done.wait [#allocation3], 24576  }
  0x26   :  { %3117 = vsyncadd [#allocation3], 4294942720 }
  0x27   :  { %3118 = dma.done.wait [#allocation6], 6144  }
  0x28   :  { %3119 = vsyncadd [#allocation6], 4294961152  ;;  %v3130_v0 = vmov 0.0|0.0   ;;  %vm3131_vm0 = vmmov 0   ;;  %v3132_v1 = vmov 0.0   ;;  %v69_v2 = vld [vmem:[%s3588_s2] sm:$0xff]  ;;  %v59_v16 = vlaneseq }
  0x29   :  { %2628 = vmatprep.subr.bf16.mxu0 %v3130_v0  ;;  %2126 = vmatprep.mubr.msk.f32.mxu0 %vm3131_vm0, %v3132_v1  ;;  %v70_v3 = vld [vmem:[%s3588_s2 + $0x8] sm:$0xff]  ;;  %v71_v4 = vld [vmem:[%s3588_s2 + $0x10] sm:$0xff]  ;;  %v72_v6 = vld [vmem:[%s3588_s2 + $0x18] sm:$0xff]  ;;  %vm3133_vm3 = vmmov 1   ;;  %vm264_vm8 = vcmask 326656   ;;  %vm1441_vm9 = vcmask 1040384  }
  0x2a   :  { %v2629_v5 = vpack.c.bf16 %v70_v3, %v69_v2  ;;  %v2632_v7 = vpack.c.bf16 %v72_v6, %v71_v4  ;;  %v73_v8 = vld [vmem:[%s3588_s2 + $0x20] sm:$0xff]  ;;  %v74_v9 = vld [vmem:[%s3588_s2 + $0x28] sm:$0xff]  ;;  %v75_v11 = vld [vmem:[%s3588_s2 + $0x30] sm:$0xff]  ;;  %v3243_v20 = vshrl.u32 %v59_v16, 7  ;;  %v182_v41 = vand.u32 127, %v59_v16  ;;  %s3134_s4 = smov [#allocation7]  }
  0x2b   :  { %v2635_v10 = vpack.c.bf16 %v74_v9, %v73_v8  ;;  %v76_v12 = vld [vmem:[%s3588_s2 + $0x38] sm:$0xff]  ;;  %v77_v14 = vld [vmem:[%s3588_s2 + $0x40] sm:$0xff]  ;;  %v78_v15 = vld [vmem:[%s3588_s2 + $0x48] sm:$0xff]  ;;  %vm1443_vm10 = vcmask 1041408   ;;  %vm1445_vm11 = vcmask 1042432   ;;  %vm1447_vm12 = vcmask 1043456  }
  0x2c   :  { %2630 = vmatpush3.bf16.msra.mxu0 %v2629_v5  ;;  %v2638_v13 = vpack.c.bf16 %v76_v12, %v75_v11  ;;  %v2641_v17 = vpack.c.bf16 %v78_v15, %v77_v14  ;;  %v79_v18 = vld [vmem:[%s3588_s2 + $0x50] sm:$0xff]  ;;  %v80_v19 = vld [vmem:[%s3588_s2 + $0x58] sm:$0xff]  ;;  %v81_v22 = vld [vmem:[%s3588_s2 + $0x60] sm:$0xff]  ;;  %v192_v42 = vand.u32 1, %v182_v41  ;;  %vm216_vm1 = vcmp.lt.s32.totalorder %v182_v41, 6  ;;  %s1803_s28 = sshll.u32 %s3134_s4, 4  ;;  %s1804_s28 = int_to_ptr.vmem [resolvable:$true] %s1803_s28 }
  0x2d   :  { %2631 = vmatprep.subr.bf16.mxu0 %v3130_v0  ;;  %v2644_v21 = vpack.c.bf16 %v80_v19, %v79_v18  ;;  %v82_v23 = vld [vmem:[%s3588_s2 + $0x68] sm:$0xff]  ;;  %v3027_v25 = vld [vmem:[%s3587_s1] ss:$0 sm:$0xff]  ;;  %v83_v26 = vld [vmem:[%s3588_s2 + $0x70] sm:$0xff]  ;;  %vm1449_vm13 = vcmask 1044480   ;;  %vm1451_vm14 = vcmask 1045504   ;;  %p3077_p3 = scmp.lt.s32.totalorder %s1804_s28, %s1804_s28 }
  0x2e   :  { %v2647_v24 = vpack.c.bf16 %v82_v23, %v81_v22  ;;  %v84_v27 = vld [vmem:[%s3588_s2 + $0x78] sm:$0xff]  ;;  %v52_v29 = vld [vmem:[%s3586_s0] sm:$0xff]  ;;  %v53_v31 = vld [vmem:[%s3586_s0 + $0x8] sm:$0xff]  ;;  %vm200_vm2 = vcmp.eq.s32.totalorder %v192_v42, 0  ;;  %vm1453_vm15 = vcmask 1046528   ;;  %s3072_s9 = scalar_lea.vmem %s1804_s28, 640 }
  0x2f   :  { %v2650_v28 = vpack.c.bf16 %v84_v27, %v83_v26  ;;  %v64_v30 = vmul.f32 %v3027_v25, %v52_v29  ;;  %v65_v32 = vmul.f32 %v3027_v25, %v53_v31  ;;  %v54_v33 = vld [vmem:[%s3586_s0 + $0x10] sm:$0xff]  ;;  %v55_v35 = vld [vmem:[%s3586_s0 + $0x18] sm:$0xff]  ;;  %v56_v37 = vld [vmem:[%s3586_s0 + $0x20] sm:$0xff]  ;;  %v2652_v39 = vpack.c.bf16 %v53_v31, %v52_v29  ;;  %p3073_p2 = scmp.ne.s32.totalorder %s1804_s28, %s3072_s9  ;;  %p3078_p4 = scmp.lt.s32.totalorder %s3072_s9, %s3072_s9 }
  0x30   :  { %2633 = vmatpush3.bf16.msra.mxu0 %v2632_v7  ;;  %v66_v34 = vmul.f32 %v3027_v25, %v54_v33  ;;  %v67_v36 = vmul.f32 %v3027_v25, %v55_v35  ;;  %v68_v38 = vmul.f32 %v3027_v25, %v56_v37  ;;  %v2656_v40 = vpack.c.bf16 %v55_v35, %v54_v33  ;;  %vm3292_vm4 = vmxor %vm216_vm1, %vm3133_vm3  ;;  %v433_v55 = vld [vmem:[#allocation2 + $0x80] sm:$0xff]  ;;  %v434_v56 = vld [vmem:[#allocation2 + $0x88] sm:$0xff] }
  0x31   :  { %2634 = vmatprep.subr.bf16.mxu0 %v3130_v0  ;;  %2653 = vmatprep.subr.bf16.mxu1 %v2652_v39  ;;  %vm3297_vm5 = vmxor %vm200_vm2, %vm3133_vm3  ;;  %v2685_v60 = vpack.c.bf16 %v434_v56, %v433_v55  ;;  %v435_v62 = vld [vmem:[#allocation2 + $0x90] sm:$0xff]  ;;  %v436_v63 = vld [vmem:[#allocation2 + $0x98] sm:$0xff]  ;;  %vm1458_vm2 = vcmask 97280   ;;  %p3079_p5 = por %p3078_p4, %p3077_p3 }
  0x32   :  { %2655 = vmatpush3.bf16.msra.mxu1 %v2652_v39  ;;  %vm3304_vm6 = vmxor %vm3292_vm4, %vm3133_vm3  ;;  %v2688_v5 = vpack.c.bf16 %v436_v63, %v435_v62  ;;  %v437_v7 = vld [vmem:[#allocation2 + $0xa0] sm:$0xff]  ;;  %v438_v8 = vld [vmem:[#allocation2 + $0xa8] sm:$0xff] }
  0x33   :  { %2657 = vmatprep.subr.bf16.mxu1 %v2656_v40  ;;  %vm206_vm7 = vmxor %vm3297_vm5, %vm3133_vm3  ;;  %v2691_v12 = vpack.c.bf16 %v438_v8, %v437_v7  ;;  %v440_v14 = vld [vmem:[#allocation2 + $0xb8] sm:$0xff]  ;;  %v442_v18 = vld [vmem:[#allocation2 + $0xc8] sm:$0xff]  ;;  %p3080_p6 = pnand %p3079_p5, %p3073_p2 }
  0x34   :  { %2636 = vmatpush3.bf16.msra.mxu0 %v2635_v10  ;;  %v444_v22 = vld [vmem:[#allocation2 + $0xd8] sm:$0xff]  ;;  %v446_v25 = vld [vmem:[#allocation2 + $0xe8] sm:$0xff]  ;;  %v346_v27 = vld [vmem:[#allocation2] sm:$0xff] }
  0x35   :  { %2637 = vmatprep.subr.bf16.mxu0 %v3130_v0  ;;  %v348_v31 = vld [vmem:[#allocation2 + $0x10] sm:$0xff]  ;;  %v350_v35 = vld [vmem:[#allocation2 + $0x20] sm:$0xff]  ;;  %v353_v39 = vld [vmem:[#allocation2 + $0x38] sm:$0xff] }
  0x36   :  { %2659 = vmatpush3.bf16.msra.mxu1 %v2656_v40  ;;  %v354_v41 = vld [vmem:[#allocation2 + $0x40] sm:$0xff]  ;;  %v355_v42 = vld [vmem:[#allocation2 + $0x48] sm:$0xff]  ;;  %v447_v62 = vld [vmem:[#allocation2 + $0xf0] sm:$0xff] }
  0x37   :  { %2149 = vmatprep.subr.mxu1 %v56_v37  ;;  %v2673_v44 = vpack.c.bf16 %v355_v42, %v354_v41  ;;  %v359_v55 = vld [vmem:[#allocation2 + $0x68] sm:$0xff]  ;;  %v448_v63 = vld [vmem:[#allocation2 + $0xf8] sm:$0xff]  ;;  %v612_v7 = vld [vmem:[#allocation2 + $0x180] sm:$0xff] }
  0x38   :  { %2639 = vmatpush3.bf16.msra.mxu0 %v2638_v13  ;;  %v439_v13 = vld [vmem:[#allocation2 + $0xb0] sm:$0xff]  ;;  %v613_v8 = vld [vmem:[#allocation2 + $0x188] sm:$0xff]  ;;  %v534_v41 = vld [vmem:[#allocation2 + $0x158] sm:$0xff] }
  0x39   :  { %2640 = vmatprep.subr.bf16.mxu0 %v3130_v0  ;;  %v2694_v15 = vpack.c.bf16 %v440_v14, %v439_v13  ;;  %v526_v13 = vld [vmem:[#allocation2 + $0x118] sm:$0xff]  ;;  %vm2950_vm1 = vmpackc.low %vm1447_vm12, %vm3133_vm3  ;;  %v1622_v43 = vld [vmem:[#allocation5 + $0x168] sm:$0xff] }
  0x3a   :  { %2150 = vmatpush3.msra.mxu1 %v56_v37 }
  0x3b   :  { %2660 = vmatprep.subr.bf16.mxu1 %v3130_v0 }
  0x3c   :  { %2642 = vmatpush3.bf16.msra.mxu0 %v2641_v17  ;;  %v441_v17 = vld [vmem:[#allocation2 + $0xc0] sm:$0xff] }
  0x3d   :  { %2643 = vmatprep.subr.bf16.mxu0 %v3130_v0  ;;  %v2697_v19 = vpack.c.bf16 %v442_v18, %v441_v17  ;;  %v614_v18 = vld [vmem:[#allocation2 + $0x190] sm:$0xff] }
  0x40   :  { %2645 = vmatpush3.bf16.msra.mxu0 %v2644_v21  ;;  %v443_v21 = vld [vmem:[#allocation2 + $0xd0] sm:$0xff] }
  0x41   :  { %2646 = vmatprep.subr.bf16.mxu0 %v3130_v0  ;;  %v2700_v23 = vpack.c.bf16 %v444_v22, %v443_v21  ;;  %v527_v22 = vld [vmem:[#allocation2 + $0x120] sm:$0xff] }
  0x44   :  { %2648 = vmatpush3.bf16.msra.mxu0 %v2647_v24  ;;  %v445_v24 = vld [vmem:[#allocation2 + $0xe0] sm:$0xff] }
  0x45   :  { %2649 = vmatprep.subr.bf16.mxu0 %v3130_v0  ;;  %v2703_v26 = vpack.c.bf16 %v446_v25, %v445_v24  ;;  %v616_v25 = vld [vmem:[#allocation2 + $0x1a0] sm:$0xff] }
  0x48   :  { %2651 = vmatpush3.bf16.msra.mxu0 %v2650_v28  ;;  %v347_v28 = vld [vmem:[#allocation2 + $0x8] sm:$0xff] }
  0x49   :  { %2684 = vmatprep.subr.bf16.mxu0 %v3130_v0 }
  0x4b   :  { %2127 = vmatmul.mubr.f32.vlgmr.msra.gmra.mrb[0].mxu0 %v64_v30  ;;  %v2661_v30 = vpack.c.bf16 %v347_v28, %v346_v27  ;;  %v529_v28 = vld [vmem:[#allocation2 + $0x130] sm:$0xff] }
  0x4c   :  { %2129 = vmatprep.mubr.msk.f32.mxu0 %vm3131_vm0, %v3132_v1  ;;  %2686 = vmatpush3.bf16.msra.mxu0 %v2685_v60 }
  0x4d   :  { %2687 = vmatprep.subr.bf16.mxu0 %v3130_v0 }
  0x4f   :  { %2130 = vmatmul.mubr.f32.gmra.mrb[2].mxu0 %v65_v32  ;;  %v349_v32 = vld [vmem:[#allocation2 + $0x18] sm:$0xff] }
  0x50   :  { %2132 = vmatprep.mubr.msk.f32.mxu0 %vm3131_vm0, %v3132_v1  ;;  %2689 = vmatpush3.bf16.msra.mxu0 %v2688_v5  ;;  %v524_v5 = vld [vmem:[#allocation2 + $0x108] sm:$0xff] }
  0x51   :  { %2690 = vmatprep.subr.bf16.mxu0 %v3130_v0 }
  0x53   :  { %2133 = vmatmul.mubr.f32.gmra.mrb[4].mxu0 %v66_v34  ;;  %v2664_v34 = vpack.c.bf16 %v349_v32, %v348_v31  ;;  %v618_v31 = vld [vmem:[#allocation2 + $0x1b0] sm:$0xff]  ;;  %v619_v32 = vld [vmem:[#allocation2 + $0x1b8] sm:$0xff] }
  0x54   :  { %2135 = vmatprep.mubr.msk.f32.mxu0 %vm3131_vm0, %v3132_v1  ;;  %2692 = vmatpush3.bf16.msra.mxu0 %v2691_v12  ;;  %v525_v12 = vld [vmem:[#allocation2 + $0x110] sm:$0xff] }
  0x55   :  { %2693 = vmatprep.subr.bf16.mxu0 %v3130_v0  ;;  %v2712_v21 = vpack.c.bf16 %v526_v13, %v525_v12  ;;  %v790_v12 = vld [vmem:[#allocation2 + $0x280] sm:$0xff]  ;;  %v791_v13 = vld [vmem:[#allocation2 + $0x288] sm:$0xff] }
  0x57   :  { %2136 = vmatmul.mubr.f32.gmra.mrb[6].mxu0 %v67_v36  ;;  %v351_v36 = vld [vmem:[#allocation2 + $0x28] sm:$0xff] }
  0x58   :  { %2138 = vmatprep.mubr.msk.f32.mxu0 %vm3131_vm0, %v3132_v1  ;;  %2695 = vmatpush3.bf16.msra.mxu0 %v2694_v15  ;;  %v2667_v37 = vpack.c.bf16 %v351_v36, %v350_v35  ;;  %v2733_v15 = vpack.c.bf16 %v613_v8, %v612_v7  ;;  %v532_v35 = vld [vmem:[#allocation2 + $0x148] sm:$0xff]  ;;  %v2742_v36 = vpack.c.bf16 %v619_v32, %v618_v31  ;;  %v701_v7 = vld [vmem:[#allocation2 + $0x200] sm:$0xff]  ;;  %v707_v32 = vld [vmem:[#allocation2 + $0x230] sm:$0xff] }
  0x59   :  { %2696 = vmatprep.subr.bf16.mxu0 %v3130_v0  ;;  %v702_v8 = vld [vmem:[#allocation2 + $0x208] sm:$0xff] }
  0x5b   :  { %2139 = vmatmul.mubr.f32.gmra.mrb[8].mxu0 %v68_v38  ;;  %v352_v38 = vld [vmem:[#allocation2 + $0x30] sm:$0xff] }
  0x5c   :  { %2221 = vmatprep.mubr.msk.f32.mxu0 %vm3131_vm0, %v3132_v1  ;;  %2698 = vmatpush3.bf16.msra.mxu0 %v2697_v19  ;;  %v2670_v40 = vpack.c.bf16 %v353_v39, %v352_v38  ;;  %v615_v19 = vld [vmem:[#allocation2 + $0x198] sm:$0xff]  ;;  %v621_v38 = vld [vmem:[#allocation2 + $0x1c8] sm:$0xff] }
  0x5d   :  { %2699 = vmatprep.subr.bf16.mxu0 %v3130_v0  ;;  %v2736_v24 = vpack.c.bf16 %v615_v19, %v614_v18  ;;  %v703_v18 = vld [vmem:[#allocation2 + $0x210] sm:$0xff]  ;;  %v704_v19 = vld [vmem:[#allocation2 + $0x218] sm:$0xff] }
  0x60   :  { %2701 = vmatpush3.bf16.msra.mxu0 %v2700_v23  ;;  %v528_v23 = vld [vmem:[#allocation2 + $0x128] sm:$0xff] }
  0x61   :  { %2702 = vmatprep.subr.bf16.mxu0 %v3130_v0  ;;  %v2715_v27 = vpack.c.bf16 %v528_v23, %v527_v22  ;;  %v792_v23 = vld [vmem:[#allocation2 + $0x290] sm:$0xff] }
  0x64   :  { %2704 = vmatpush3.bf16.msra.mxu0 %v2703_v26  ;;  %v617_v26 = vld [vmem:[#allocation2 + $0x1a8] sm:$0xff] }
  0x65   :  { %2705 = vmatprep.subr.bf16.mxu0 %v3130_v0 }
 0x11e   :  { %v3311_v46 = vpop.f32.mrb[0].mxu0 }
 0x11f   :  { %v227_v47 = vsel %vm3304_vm6, %v3311_v46, 0.0  ;;  %v2128_v48 = vpop.f32.mrb[1].mxu0  ;;  %v211_v49 = vsel %vm206_vm7, %v3311_v46, 0.0 }
 0x120   :  { %232 = vxpose.xlu0.b32.start [1/5] (short) (narrow) %v211_v49, 16  ;;  %v356_v48 = vld [vmem:[#allocation2 + $0x50] sm:$0xff]  ;;  %v357_v49 = vld [vmem:[#allocation2 + $0x58] sm:$0xff] }
 0x122   :  { %v3317_v50 = vpop.f32.mrb[2].mxu0 }
 0x123   :  { %v228_v51 = vsel %vm3304_vm6, %v3317_v50, 0.0  ;;  %v2131_v52 = vpop.f32.mrb[3].mxu0  ;;  %v212_v53 = vsel %vm206_vm7, %v3317_v50, 0.0 }
 0x124   :  { %233 = vxpose.xlu0.b32.cont [2/5] (short) (narrow) %v212_v53, 16  ;;  %v2676_v52 = vpack.c.bf16 %v357_v49, %v356_v48  ;;  %v358_v53 = vld [vmem:[#allocation2 + $0x60] sm:$0xff]  ;;  %v623_v48 = vld [vmem:[#allocation2 + $0x1d8] sm:$0xff] }
 0x125   :  { %v2679_v56 = vpack.c.bf16 %v359_v55, %v358_v53  ;;  %v536_v53 = vld [vmem:[#allocation2 + $0x168] sm:$0xff] }
 0x126   :  { %v3323_v54 = vpop.f32.mrb[4].mxu0 }
 0x127   :  { %v229_v57 = vsel %vm3292_vm4, %v3323_v54, 0.0  ;;  %v2134_v58 = vpop.f32.mrb[5].mxu0  ;;  %v213_v59 = vsel %vm3297_vm5, %v3323_v54, 0.0 }
 0x128   :  { %234 = vxpose.xlu0.b32.cont [3/5] (short) (narrow) %v213_v59, 16  ;;  %v360_v58 = vld [vmem:[#allocation2 + $0x70] sm:$0xff]  ;;  %v361_v59 = vld [vmem:[#allocation2 + $0x78] sm:$0xff] }
 0x129   :  { %v2682_v60 = vpack.c.bf16 %v361_v59, %v360_v58  ;;  %v625_v58 = vld [vmem:[#allocation2 + $0x1e8] sm:$0xff] }
 0x12a   :  { %v3331_v61 = vpop.f32.mrb[6].mxu0 }
 0x12b   :  { %v230_v2 = vsel %vm3292_vm4, %v3331_v61, 0.0  ;;  %v2137_v3 = vpop.f32.mrb[7].mxu0  ;;  %v214_v4 = vsel %vm3297_vm5, %v3331_v61, 0.0 }
 0x12c   :  { %235 = vxpose.xlu0.b32.cont [4/5] (short) (narrow) %v214_v4, 16  ;;  %v2706_v3 = vpack.c.bf16 %v448_v63, %v447_v62  ;;  %v523_v4 = vld [vmem:[#allocation2 + $0x100] sm:$0xff]  ;;  %v538_v62 = vld [vmem:[#allocation2 + $0x178] sm:$0xff] }
 0x12e   :  { %v3340_v6 = vpop.f32.mrb[8].mxu0  ;;  %2707 = vmatpush3.bf16.msra.mxu0 %v2706_v3  ;;  %v626_v3 = vld [vmem:[#allocation2 + $0x1f0] sm:$0xff] }
 0x12f   :  { %v231_v9 = vsel %vm3292_vm4, %v3340_v6, 0.0  ;;  %v2140_v10 = vpop.f32.mrb[9].mxu0  ;;  %v215_v11 = vsel %vm3297_vm5, %v3340_v6, 0.0  ;;  %2732 = vmatprep.subr.bf16.mxu0 %v3130_v0 }
 0x130   :  { %236 = vxpose.xlu0.b32.end [5/5] (short) (narrow) %v215_v11, 16  ;;  %v2709_v10 = vpack.c.bf16 %v524_v5, %v523_v4  ;;  %v627_v4 = vld [vmem:[#allocation2 + $0x1f8] sm:$0xff] }
 0x1a0   :  { %v248_v29 = vpop.trf.xlu0 }
 0x1a1   :  { %2151 = vmatprep.mubr.msk.f32.mxu1 %vm264_vm8, %v248_v29  ;;  %v530_v29 = vld [vmem:[#allocation2 + $0x138] sm:$0xff] }
 0x1a4   :  { %v249_v33 = vpop.trf.xlu0 }
 0x1a5   :  { %2152 = vmatmul.mubr.msk.f32.vlgmr.msra.gmra.mrb[0].mxu1 %vm264_vm8, %v249_v33  ;;  %v2718_v33 = vpack.c.bf16 %v530_v29, %v529_v28  ;;  %v794_v29 = vld [vmem:[#allocation2 + $0x2a0] sm:$0xff] }
 0x1a6   :  { %2662 = vmatpush3.bf16.msra.mxu1 %v2661_v30  ;;  %2186 = vmatprep.mubr.msk.f32.mxu1 %vm3131_vm0, %v3132_v1  ;;  %v2739_v30 = vpack.c.bf16 %v617_v26, %v616_v25  ;;  %v2760_v25 = vpack.c.bf16 %v704_v19, %v703_v18  ;;  %v705_v26 = vld [vmem:[#allocation2 + $0x220] sm:$0xff]  ;;  %v969_v19 = vld [vmem:[#allocation2 + $0x388] sm:$0xff] }
 0x1a7   :  { %2663 = vmatprep.subr.bf16.mxu1 %v3130_v0  ;;  %v968_v18 = vld [vmem:[#allocation2 + $0x380] sm:$0xff] }
 0x1aa   :  { %2665 = vmatpush3.bf16.msra.mxu1 %v2664_v34  ;;  %v531_v34 = vld [vmem:[#allocation2 + $0x140] sm:$0xff] }
 0x1ab   :  { %2666 = vmatprep.subr.bf16.mxu1 %v3130_v0  ;;  %v2721_v39 = vpack.c.bf16 %v532_v35, %v531_v34  ;;  %v796_v35 = vld [vmem:[#allocation2 + $0x2b0] sm:$0xff] }
 0x1ae   :  { %2668 = vmatpush3.bf16.msra.mxu1 %v2667_v37  ;;  %v620_v37 = vld [vmem:[#allocation2 + $0x1c0] sm:$0xff] }
 0x1af   :  { %2669 = vmatprep.subr.bf16.mxu1 %v3130_v0  ;;  %v2745_v42 = vpack.c.bf16 %v621_v38, %v620_v37  ;;  %v709_v38 = vld [vmem:[#allocation2 + $0x240] sm:$0xff] }
 0x1b2   :  { %2671 = vmatpush3.bf16.msra.mxu1 %v2670_v40  ;;  %v533_v40 = vld [vmem:[#allocation2 + $0x150] sm:$0xff] }
 0x1b3   :  { %2672 = vmatprep.subr.bf16.mxu1 %v3130_v0  ;;  %v2724_v49 = vpack.c.bf16 %v534_v41, %v533_v40  ;;  %v798_v41 = vld [vmem:[#allocation2 + $0x2c0] sm:$0xff] }
 0x1b6   :  { %2674 = vmatpush3.bf16.msra.mxu1 %v2673_v44  ;;  %v622_v44 = vld [vmem:[#allocation2 + $0x1d0] sm:$0xff] }
 0x1b7   :  { %2675 = vmatprep.subr.bf16.mxu1 %v3130_v0  ;;  %v2748_v55 = vpack.c.bf16 %v623_v48, %v622_v44  ;;  %v711_v48 = vld [vmem:[#allocation2 + $0x250] sm:$0xff] }
 0x1ba   :  { %2677 = vmatpush3.bf16.msra.mxu1 %v2676_v52  ;;  %v535_v52 = vld [vmem:[#allocation2 + $0x160] sm:$0xff] }
 0x1bb   :  { %2678 = vmatprep.subr.bf16.mxu1 %v3130_v0  ;;  %v2727_v59 = vpack.c.bf16 %v536_v53, %v535_v52  ;;  %v800_v53 = vld [vmem:[#allocation2 + $0x2d0] sm:$0xff] }
 0x1be   :  { %2680 = vmatpush3.bf16.msra.mxu1 %v2679_v56  ;;  %v624_v56 = vld [vmem:[#allocation2 + $0x1e0] sm:$0xff] }
 0x1bf   :  { %2681 = vmatprep.subr.bf16.mxu1 %v3130_v0  ;;  %v2751_v63 = vpack.c.bf16 %v625_v58, %v624_v56  ;;  %v713_v58 = vld [vmem:[#allocation2 + $0x260] sm:$0xff] }
 0x1c2   :  { %2683 = vmatpush3.bf16.msra.mxu1 %v2682_v60  ;;  %v537_v60 = vld [vmem:[#allocation2 + $0x170] sm:$0xff] }
 0x1c3   :  { %2708 = vmatprep.subr.bf16.mxu1 %v3130_v0  ;;  %v2730_v5 = vpack.c.bf16 %v538_v62, %v537_v60  ;;  %v802_v62 = vld [vmem:[#allocation2 + $0x2e0] sm:$0xff] }
 0x278   :  { %v3365_v11 = vpop.f32.mrb[0].mxu1 }
 0x279   :  { %v3367_v14 = vpop.f32.mrb[1].mxu1 }
 0x27a   :  { %2187 = vmatmul.mubr.f32.vlgmr.msra.gmra.mrb[2].mxu1 %v3367_v14  ;;  %v450_v17 = vrot.slane %v3367_v14, 1  ;;  %v628_v22 = vrot.slane %v3367_v14, 3 }
 0x27b   :  { %2710 = vmatpush3.bf16.msra.mxu1 %v2709_v10  ;;  %2256 = vmatprep.mubr.msk.f32.mxu1 %vm3131_vm0, %v3132_v1  ;;  %v2754_v10 = vpack.c.bf16 %v627_v4, %v626_v3  ;;  %v715_v4 = vld [vmem:[#allocation2 + $0x270] sm:$0xff] }
 0x27c   :  { %2222 = vmatmul.mubr.f32.vlgmr.msra.gmra.mrb[10].mxu0 %v450_v17  ;;  %2711 = vmatprep.subr.bf16.mxu1 %v3130_v0  ;;  %v539_v17 = vrot.slane %v3367_v14, 2 }
 0x27d   :  { %2734 = vmatpush3.bf16.msra.mxu0 %v2733_v15  ;;  %2291 = vmatprep.mubr.msk.f32.mxu0 %vm3131_vm0, %v3132_v1  ;;  %v2757_v15 = vpack.c.bf16 %v702_v8, %v701_v7  ;;  %v804_v8 = vld [vmem:[#allocation2 + $0x2f0] sm:$0xff] }
 0x27e   :  { %2735 = vmatprep.subr.bf16.mxu0 %v3130_v0 }
 0x27f   :  { %2713 = vmatpush3.bf16.msra.mxu1 %v2712_v21  ;;  %v2781_v21 = vpack.c.bf16 %v791_v13, %v790_v12  ;;  %v879_v13 = vld [vmem:[#allocation2 + $0x300] sm:$0xff] }
 0x280   :  { %2714 = vmatprep.subr.bf16.mxu1 %v3130_v0 }
 0x281   :  { %2737 = vmatpush3.bf16.msra.mxu0 %v2736_v24  ;;  %v793_v24 = vld [vmem:[#allocation2 + $0x298] sm:$0xff] }
 0x282   :  { %2738 = vmatprep.subr.bf16.mxu0 %v3130_v0  ;;  %v2784_v28 = vpack.c.bf16 %v793_v24, %v792_v23  ;;  %v881_v23 = vld [vmem:[#allocation2 + $0x310] sm:$0xff]  ;;  %v882_v24 = vld [vmem:[#allocation2 + $0x318] sm:$0xff] }
 0x283   :  { %2716 = vmatpush3.bf16.msra.mxu1 %v2715_v27  ;;  %v706_v27 = vld [vmem:[#allocation2 + $0x228] sm:$0xff] }
 0x284   :  { %2717 = vmatprep.subr.bf16.mxu1 %v3130_v0  ;;  %v2763_v31 = vpack.c.bf16 %v706_v27, %v705_v26  ;;  %v806_v26 = vrot.slane %v3367_v14, 5  ;;  %v970_v27 = vld [vmem:[#allocation2 + $0x390] sm:$0xff] }
 0x285   :  { %2740 = vmatpush3.bf16.msra.mxu0 %v2739_v30  ;;  %v795_v30 = vld [vmem:[#allocation2 + $0x2a8] sm:$0xff] }
 0x286   :  { %2741 = vmatprep.subr.bf16.mxu0 %v3130_v0  ;;  %v2787_v34 = vpack.c.bf16 %v795_v30, %v794_v29  ;;  %v2808_v29 = vpack.c.bf16 %v882_v24, %v881_v23  ;;  %v883_v30 = vld [vmem:[#allocation2 + $0x320] sm:$0xff]  ;;  %v1145_v24 = vld [vmem:[#allocation2 + $0x488] sm:$0xff] }
 0x287   :  { %2719 = vmatpush3.bf16.msra.mxu1 %v2718_v33  ;;  %v708_v33 = vld [vmem:[#allocation2 + $0x238] sm:$0xff]  ;;  %v1144_v23 = vld [vmem:[#allocation2 + $0x480] sm:$0xff] }
 0x288   :  { %2720 = vmatprep.subr.bf16.mxu1 %v3130_v0  ;;  %v2766_v37 = vpack.c.bf16 %v708_v33, %v707_v32  ;;  %v972_v33 = vld [vmem:[#allocation2 + $0x3a0] sm:$0xff] }
 0x289   :  { %2743 = vmatpush3.bf16.msra.mxu0 %v2742_v36  ;;  %v797_v36 = vld [vmem:[#allocation2 + $0x2b8] sm:$0xff] }
 0x28a   :  { %2744 = vmatprep.subr.bf16.mxu0 %v3130_v0  ;;  %v2790_v40 = vpack.c.bf16 %v797_v36, %v796_v35  ;;  %v885_v36 = vld [vmem:[#allocation2 + $0x330] sm:$0xff] }
 0x28b   :  { %2722 = vmatpush3.bf16.msra.mxu1 %v2721_v39  ;;  %v710_v39 = vld [vmem:[#allocation2 + $0x248] sm:$0xff] }
 0x28c   :  { %2723 = vmatprep.subr.bf16.mxu1 %v3130_v0  ;;  %v2769_v44 = vpack.c.bf16 %v710_v39, %v709_v38  ;;  %v974_v39 = vld [vmem:[#allocation2 + $0x3b0] sm:$0xff] }
 0x28d   :  { %2746 = vmatpush3.bf16.msra.mxu0 %v2745_v42  ;;  %v799_v42 = vld [vmem:[#allocation2 + $0x2c8] sm:$0xff] }
 0x28e   :  { %2747 = vmatprep.subr.bf16.mxu0 %v3130_v0  ;;  %v2793_v52 = vpack.c.bf16 %v799_v42, %v798_v41  ;;  %v887_v42 = vld [vmem:[#allocation2 + $0x340] sm:$0xff] }
 0x28f   :  { %2725 = vmatpush3.bf16.msra.mxu1 %v2724_v49  ;;  %v712_v49 = vld [vmem:[#allocation2 + $0x258] sm:$0xff] }
 0x290   :  { %2726 = vmatprep.subr.bf16.mxu1 %v3130_v0  ;;  %v2772_v56 = vpack.c.bf16 %v712_v49, %v711_v48  ;;  %v976_v49 = vld [vmem:[#allocation2 + $0x3c0] sm:$0xff] }
 0x291   :  { %2749 = vmatpush3.bf16.msra.mxu0 %v2748_v55  ;;  %v801_v55 = vld [vmem:[#allocation2 + $0x2d8] sm:$0xff] }
 0x292   :  { %2750 = vmatprep.subr.bf16.mxu0 %v3130_v0  ;;  %v2796_v60 = vpack.c.bf16 %v801_v55, %v800_v53  ;;  %v889_v55 = vld [vmem:[#allocation2 + $0x350] sm:$0xff] }
 0x293   :  { %2728 = vmatpush3.bf16.msra.mxu1 %v2727_v59  ;;  %v714_v59 = vld [vmem:[#allocation2 + $0x268] sm:$0xff] }
 0x294   :  { %2729 = vmatprep.subr.bf16.mxu1 %v3130_v0  ;;  %v2775_v3 = vpack.c.bf16 %v714_v59, %v713_v58  ;;  %v978_v59 = vld [vmem:[#allocation2 + $0x3d0] sm:$0xff] }
 0x295   :  { %2752 = vmatpush3.bf16.msra.mxu0 %v2751_v63  ;;  %v803_v63 = vld [vmem:[#allocation2 + $0x2e8] sm:$0xff] }
 0x296   :  { %2753 = vmatprep.subr.bf16.mxu0 %v3130_v0  ;;  %v2799_v7 = vpack.c.bf16 %v803_v63, %v802_v62  ;;  %v891_v63 = vld [vmem:[#allocation2 + $0x360] sm:$0xff] }
 0x297   :  { %2731 = vmatpush3.bf16.msra.mxu1 %v2730_v5  ;;  %v716_v5 = vld [vmem:[#allocation2 + $0x278] sm:$0xff] }
 0x298   :  { %2756 = vmatprep.subr.bf16.mxu1 %v3130_v0  ;;  %v2778_v12 = vpack.c.bf16 %v716_v5, %v715_v4  ;;  %v980_v5 = vld [vmem:[#allocation2 + $0x3e0] sm:$0xff] }
 0x299   :  { %2755 = vmatpush3.bf16.msra.mxu0 %v2754_v10  ;;  %v805_v10 = vld [vmem:[#allocation2 + $0x2f8] sm:$0xff] }
 0x29a   :  { %2257 = vmatmul.mubr.f32.vlgmr.msra.gmra.mrb[4].mxu1 %v539_v17  ;;  %2780 = vmatprep.subr.bf16.mxu0 %v3130_v0  ;;  %v2802_v17 = vpack.c.bf16 %v805_v10, %v804_v8  ;;  %v893_v10 = vld [vmem:[#allocation2 + $0x370] sm:$0xff] }
 0x29b   :  { %2758 = vmatpush3.bf16.msra.mxu1 %v2757_v15  ;;  %2326 = vmatprep.mubr.msk.f32.mxu1 %vm3131_vm0, %v3132_v1  ;;  %v880_v15 = vld [vmem:[#allocation2 + $0x308] sm:$0xff] }
 0x29c   :  { %2292 = vmatmul.mubr.f32.vlgmr.msra.gmra.mrb[12].mxu0 %v628_v22  ;;  %2759 = vmatprep.subr.bf16.mxu1 %v3130_v0  ;;  %v717_v22 = vrot.slane %v3367_v14, 4 }
 0x29d   :  { %2782 = vmatpush3.bf16.msra.mxu0 %v2781_v21  ;;  %2361 = vmatprep.mubr.msk.f32.mxu0 %vm3131_vm0, %v3132_v1  ;;  %v2805_v21 = vpack.c.bf16 %v880_v15, %v879_v13  ;;  %v982_v15 = vld [vmem:[#allocation2 + $0x3f0] sm:$0xff] }
 0x29e   :  { %2783 = vmatprep.subr.bf16.mxu0 %v3130_v0 }
 0x29f   :  { %2761 = vmatpush3.bf16.msra.mxu1 %v2760_v25  ;;  %v2829_v25 = vpack.c.bf16 %v969_v19, %v968_v18  ;;  %v1057_v19 = vld [vmem:[#allocation2 + $0x400] sm:$0xff] }
 0x2a0   :  { %2762 = vmatprep.subr.bf16.mxu1 %v3130_v0 }
 0x2a1   :  { %2785 = vmatpush3.bf16.msra.mxu0 %v2784_v28  ;;  %v971_v28 = vld [vmem:[#allocation2 + $0x398] sm:$0xff] }
 0x2a2   :  { %2786 = vmatprep.subr.bf16.mxu0 %v3130_v0  ;;  %v2832_v32 = vpack.c.bf16 %v971_v28, %v970_v27  ;;  %v1059_v27 = vld [vmem:[#allocation2 + $0x410] sm:$0xff]  ;;  %v1060_v28 = vld [vmem:[#allocation2 + $0x418] sm:$0xff] }
 0x2a3   :  { %2764 = vmatpush3.bf16.msra.mxu1 %v2763_v31  ;;  %v884_v31 = vld [vmem:[#allocation2 + $0x328] sm:$0xff] }
 0x2a4   :  { %2765 = vmatprep.subr.bf16.mxu1 %v3130_v0  ;;  %v2811_v35 = vpack.c.bf16 %v884_v31, %v883_v30  ;;  %v984_v30 = vrot.slane %v3367_v14, 7  ;;  %v1146_v31 = vld [vmem:[#allocation2 + $0x490] sm:$0xff] }
 0x2a5   :  { %2788 = vmatpush3.bf16.msra.mxu0 %v2787_v34  ;;  %v973_v34 = vld [vmem:[#allocation2 + $0x3a8] sm:$0xff] }
 0x2a6   :  { %2789 = vmatprep.subr.bf16.mxu0 %v3130_v0  ;;  %v2835_v38 = vpack.c.bf16 %v973_v34, %v972_v33  ;;  %v2856_v33 = vpack.c.bf16 %v1060_v28, %v1059_v27  ;;  %v1061_v34 = vld [vmem:[#allocation2 + $0x420] sm:$0xff]  ;;  %v1324_v27 = vld [vmem:[#allocation2 + $0x588] sm:$0xff] }
 0x2a7   :  { %2767 = vmatpush3.bf16.msra.mxu1 %v2766_v37  ;;  %v886_v37 = vld [vmem:[#allocation2 + $0x338] sm:$0xff] }
 0x2a8   :  { %2768 = vmatprep.subr.bf16.mxu1 %v3130_v0  ;;  %v2814_v41 = vpack.c.bf16 %v886_v37, %v885_v36  ;;  %v1149_v37 = vld [vmem:[#allocation2 + $0x4a8] sm:$0xff] }
 0x2a9   :  { %2791 = vmatpush3.bf16.msra.mxu0 %v2790_v40  ;;  %v975_v40 = vld [vmem:[#allocation2 + $0x3b8] sm:$0xff] }
 0x2aa   :  { %2792 = vmatprep.subr.bf16.mxu0 %v3130_v0  ;;  %v2838_v48 = vpack.c.bf16 %v975_v40, %v974_v39  ;;  %v1063_v39 = vld [vmem:[#allocation2 + $0x430] sm:$0xff]  ;;  %v1064_v40 = vld [vmem:[#allocation2 + $0x438] sm:$0xff] }
 0x2ab   :  { %2770 = vmatpush3.bf16.msra.mxu1 %v2769_v44  ;;  %v888_v44 = vld [vmem:[#allocation2 + $0x348] sm:$0xff] }
 0x2ac   :  { %2771 = vmatprep.subr.bf16.mxu1 %v3130_v0  ;;  %v2817_v53 = vpack.c.bf16 %v888_v44, %v887_v42  ;;  %v1150_v42 = vld [vmem:[#allocation2 + $0x4b0] sm:$0xff]  ;;  %v1151_v44 = vld [vmem:[#allocation2 + $0x4b8] sm:$0xff] }
 0x2ad   :  { %2794 = vmatpush3.bf16.msra.mxu0 %v2793_v52  ;;  %v977_v52 = vld [vmem:[#allocation2 + $0x3c8] sm:$0xff] }
 0x2ae   :  { %2795 = vmatprep.subr.bf16.mxu0 %v3130_v0  ;;  %v2841_v58 = vpack.c.bf16 %v977_v52, %v976_v49  ;;  %v1065_v49 = vld [vmem:[#allocation2 + $0x440] sm:$0xff]  ;;  %v1066_v52 = vld [vmem:[#allocation2 + $0x448] sm:$0xff] }
 0x2af   :  { %2773 = vmatpush3.bf16.msra.mxu1 %v2772_v56  ;;  %v890_v56 = vld [vmem:[#allocation2 + $0x358] sm:$0xff] }
 0x2b0   :  { %2774 = vmatprep.subr.bf16.mxu1 %v3130_v0  ;;  %v2820_v62 = vpack.c.bf16 %v890_v56, %v889_v55  ;;  %v1152_v55 = vld [vmem:[#allocation2 + $0x4c0] sm:$0xff]  ;;  %v1153_v56 = vld [vmem:[#allocation2 + $0x4c8] sm:$0xff] }
 0x2b1   :  { %2797 = vmatpush3.bf16.msra.mxu0 %v2796_v60  ;;  %v979_v60 = vld [vmem:[#allocation2 + $0x3d8] sm:$0xff] }
 0x2b2   :  { %2798 = vmatprep.subr.bf16.mxu0 %v3130_v0  ;;  %v2844_v4 = vpack.c.bf16 %v979_v60, %v978_v59  ;;  %v1067_v59 = vld [vmem:[#allocation2 + $0x450] sm:$0xff]  ;;  %v1068_v60 = vld [vmem:[#allocation2 + $0x458] sm:$0xff] }
 0x2b3   :  { %2776 = vmatpush3.bf16.msra.mxu1 %v2775_v3  ;;  %v892_v3 = vld [vmem:[#allocation2 + $0x368] sm:$0xff] }
 0x2b4   :  { %2777 = vmatprep.subr.bf16.mxu1 %v3130_v0  ;;  %v2823_v8 = vpack.c.bf16 %v892_v3, %v891_v63  ;;  %v1154_v63 = vld [vmem:[#allocation2 + $0x4d0] sm:$0xff]  ;;  %v1155_v3 = vld [vmem:[#allocation2 + $0x4d8] sm:$0xff] }
 0x2b5   :  { %2800 = vmatpush3.bf16.msra.mxu0 %v2799_v7  ;;  %v981_v7 = vld [vmem:[#allocation2 + $0x3e8] sm:$0xff] }
 0x2b6   :  { %2801 = vmatprep.subr.bf16.mxu0 %v3130_v0  ;;  %v2847_v13 = vpack.c.bf16 %v981_v7, %v980_v5  ;;  %v1069_v5 = vld [vmem:[#allocation2 + $0x460] sm:$0xff]  ;;  %v1070_v7 = vld [vmem:[#allocation2 + $0x468] sm:$0xff] }
 0x2b7   :  { %2779 = vmatpush3.bf16.msra.mxu1 %v2778_v12  ;;  %v894_v12 = vld [vmem:[#allocation2 + $0x378] sm:$0xff] }
 0x2b8   :  { %2804 = vmatprep.subr.bf16.mxu1 %v3130_v0  ;;  %v2826_v18 = vpack.c.bf16 %v894_v12, %v893_v10  ;;  %v1156_v10 = vld [vmem:[#allocation2 + $0x4e0] sm:$0xff]  ;;  %v1157_v12 = vld [vmem:[#allocation2 + $0x4e8] sm:$0xff] }
 0x2b9   :  { %2803 = vmatpush3.bf16.msra.mxu0 %v2802_v17  ;;  %v983_v17 = vld [vmem:[#allocation2 + $0x3f8] sm:$0xff] }
 0x2ba   :  { %2327 = vmatmul.mubr.f32.vlgmr.msra.gmra.mrb[6].mxu1 %v717_v22  ;;  %2828 = vmatprep.subr.bf16.mxu0 %v3130_v0  ;;  %v2850_v22 = vpack.c.bf16 %v983_v17, %v982_v15  ;;  %v1071_v15 = vld [vmem:[#allocation2 + $0x470] sm:$0xff]  ;;  %v1072_v17 = vld [vmem:[#allocation2 + $0x478] sm:$0xff] }
 0x2bb   :  { %2806 = vmatpush3.bf16.msra.mxu1 %v2805_v21  ;;  %2396 = vmatprep.mubr.msk.f32.mxu1 %vm3131_vm0, %v3132_v1  ;;  %v1058_v21 = vld [vmem:[#allocation2 + $0x408] sm:$0xff] }
 0x2bc   :  { %2362 = vmatmul.mubr.f32.vlgmr.msra.gmra.mrb[14].mxu0 %v806_v26  ;;  %2807 = vmatprep.subr.bf16.mxu1 %v3130_v0  ;;  %v895_v26 = vrot.slane %v3367_v14, 6  ;;  %v1148_v14 = vld [vmem:[#allocation2 + $0x4a0] sm:$0xff] }
 0x2bd   :  { %2830 = vmatpush3.bf16.msra.mxu0 %v2829_v25  ;;  %2431 = vmatprep.mubr.msk.f32.mxu0 %vm3131_vm0, %v3132_v1  ;;  %v2853_v25 = vpack.c.bf16 %v1058_v21, %v1057_v19  ;;  %v1158_v19 = vld [vmem:[#allocation2 + $0x4f0] sm:$0xff]  ;;  %v1159_v21 = vld [vmem:[#allocation2 + $0x4f8] sm:$0xff] }
 0x2be   :  { %2831 = vmatprep.subr.bf16.mxu0 %v3130_v0 }
 0x2bf   :  { %2809 = vmatpush3.bf16.msra.mxu1 %v2808_v29  ;;  %v2877_v29 = vpack.c.bf16 %v1145_v24, %v1144_v23  ;;  %v1234_v23 = vld [vmem:[#allocation2 + $0x500] sm:$0xff]  ;;  %v1235_v24 = vld [vmem:[#allocation2 + $0x508] sm:$0xff] }
 0x2c0   :  { %2810 = vmatprep.subr.bf16.mxu1 %v3130_v0  ;;  %v2901_v28 = vpack.c.bf16 %v1235_v24, %v1234_v23  ;;  %v1338_v23 = vld [vmem:[#allocation2 + $0x5f8] sm:$0xff] }
 0x2c1   :  { %2833 = vmatpush3.bf16.msra.mxu0 %v2832_v32  ;;  %v1147_v32 = vld [vmem:[#allocation2 + $0x498] sm:$0xff] }
 0x2c2   :  { %2834 = vmatprep.subr.bf16.mxu0 %v3130_v0  ;;  %v2880_v36 = vpack.c.bf16 %v1147_v32, %v1146_v31  ;;  %v1161_v32 = vrot.slane %v3365_v11, 1 }
 0x2c3   :  { %2812 = vmatpush3.bf16.msra.mxu1 %v2811_v35  ;;  %v1062_v35 = vld [vmem:[#allocation2 + $0x428] sm:$0xff] }
 0x2c4   :  { %2813 = vmatprep.subr.bf16.mxu1 %v3130_v0 }
 0x2c5   :  { %2836 = vmatpush3.bf16.msra.mxu0 %v2835_v38  ;;  %v2859_v38 = vpack.c.bf16 %v1062_v35, %v1061_v34  ;;  %v1326_v34 = vld [vmem:[#allocation2 + $0x598] sm:$0xff] }
 0x2c6   :  { %2837 = vmatprep.subr.bf16.mxu0 %v3130_v0 }
 0x2c7   :  { %2815 = vmatpush3.bf16.msra.mxu1 %v2814_v41  ;;  %v2883_v41 = vpack.c.bf16 %v1149_v37, %v1148_v14  ;;  %v1239_v14 = vld [vmem:[#allocation2 + $0x528] sm:$0xff] }
 0x2c8   :  { %2816 = vmatprep.subr.bf16.mxu1 %v3130_v0 }
 0x2c9   :  { %2839 = vmatpush3.bf16.msra.mxu0 %v2838_v48  ;;  %v2862_v48 = vpack.c.bf16 %v1064_v40, %v1063_v39  ;;  %v1328_v39 = vld [vmem:[#allocation2 + $0x5a8] sm:$0xff] }
 0x2ca   :  { %2840 = vmatprep.subr.bf16.mxu0 %v3130_v0 }
 0x2cb   :  { %2818 = vmatpush3.bf16.msra.mxu1 %v2817_v53  ;;  %v2886_v53 = vpack.c.bf16 %v1151_v44, %v1150_v42  ;;  %v1241_v42 = vld [vmem:[#allocation2 + $0x538] sm:$0xff] }
 0x2cc   :  { %2819 = vmatprep.subr.bf16.mxu1 %v3130_v0 }
 0x2cd   :  { %2842 = vmatpush3.bf16.msra.mxu0 %v2841_v58  ;;  %v2865_v58 = vpack.c.bf16 %v1066_v52, %v1065_v49  ;;  %v1330_v49 = vld [vmem:[#allocation2 + $0x5b8] sm:$0xff] }
 0x2ce   :  { %2843 = vmatprep.subr.bf16.mxu0 %v3130_v0 }
 0x2cf   :  { %2821 = vmatpush3.bf16.msra.mxu1 %v2820_v62  ;;  %v2889_v62 = vpack.c.bf16 %v1153_v56, %v1152_v55  ;;  %v1243_v55 = vld [vmem:[#allocation2 + $0x548] sm:$0xff] }
 0x2d0   :  { %2822 = vmatprep.subr.bf16.mxu1 %v3130_v0 }
 0x2d1   :  { %2845 = vmatpush3.bf16.msra.mxu0 %v2844_v4  ;;  %v2868_v4 = vpack.c.bf16 %v1068_v60, %v1067_v59  ;;  %v1332_v59 = vld [vmem:[#allocation2 + $0x5c8] sm:$0xff] }
 0x2d2   :  { %2846 = vmatprep.subr.bf16.mxu0 %v3130_v0 }
 0x2d3   :  { %2824 = vmatpush3.bf16.msra.mxu1 %v2823_v8  ;;  %v2892_v8 = vpack.c.bf16 %v1155_v3, %v1154_v63  ;;  %v1245_v63 = vld [vmem:[#allocation2 + $0x558] sm:$0xff] }
 0x2d4   :  { %2825 = vmatprep.subr.bf16.mxu1 %v3130_v0 }
 0x2d5   :  { %2848 = vmatpush3.bf16.msra.mxu0 %v2847_v13  ;;  %v2871_v13 = vpack.c.bf16 %v1070_v7, %v1069_v5  ;;  %v1334_v5 = vld [vmem:[#allocation2 + $0x5d8] sm:$0xff] }
 0x2d6   :  { %2849 = vmatprep.subr.bf16.mxu0 %v3130_v0 }
 0x2d7   :  { %2827 = vmatpush3.bf16.msra.mxu1 %v2826_v18  ;;  %v2895_v18 = vpack.c.bf16 %v1157_v12, %v1156_v10  ;;  %v1247_v10 = vld [vmem:[#allocation2 + $0x568] sm:$0xff] }
 0x2d8   :  { %2852 = vmatprep.subr.bf16.mxu1 %v3130_v0 }
 0x2d9   :  { %2851 = vmatpush3.bf16.msra.mxu0 %v2850_v22  ;;  %v2874_v22 = vpack.c.bf16 %v1072_v17, %v1071_v15  ;;  %v1336_v15 = vld [vmem:[#allocation2 + $0x5e8] sm:$0xff] }
 0x2da   :  { %2397 = vmatmul.mubr.f32.vlgmr.msra.gmra.mrb[8].mxu1 %v895_v26  ;;  %2876 = vmatprep.subr.bf16.mxu0 %v3130_v0  ;;  %v1323_v26 = vld [vmem:[#allocation2 + $0x580] sm:$0xff] }
 0x2db   :  { %2854 = vmatpush3.bf16.msra.mxu1 %v2853_v25  ;;  %2466 = vmatprep.mubr.msk.f32.mxu1 %vm3131_vm0, %v3132_v1  ;;  %v2898_v25 = vpack.c.bf16 %v1159_v21, %v1158_v19  ;;  %v2925_v31 = vpack.c.bf16 %v1324_v27, %v1323_v26  ;;  %v1249_v19 = vld [vmem:[#allocation2 + $0x578] sm:$0xff]  ;;  %v1250_v26 = vrot.slane %v3365_v11, 2  ;;  %v1339_v27 = vrot.slane %v3365_v11, 3 }
 0x2dc   :  { %2432 = vmatmul.mubr.f32.vlgmr.msra.gmra.mrb[16].mxu0 %v984_v30  ;;  %2855 = vmatprep.subr.bf16.mxu1 %v3130_v0  ;;  %v1237_v30 = vld [vmem:[#allocation2 + $0x518] sm:$0xff] }
 0x2dd   :  { %2878 = vmatpush3.bf16.msra.mxu0 %v2877_v29  ;;  %2501 = vmatprep.mubr.msk.f32.mxu0 %vm3131_vm0, %v3132_v1  ;;  %v1236_v29 = vld [vmem:[#allocation2 + $0x510] sm:$0xff] }
 0x2de   :  { %2879 = vmatprep.subr.bf16.mxu0 %v3130_v0  ;;  %v2904_v35 = vpack.c.bf16 %v1237_v30, %v1236_v29 }
 0x2df   :  { %2857 = vmatpush3.bf16.msra.mxu1 %v2856_v33  ;;  %v1325_v33 = vld [vmem:[#allocation2 + $0x590] sm:$0xff] }
 0x2e0   :  { %2858 = vmatprep.subr.bf16.mxu1 %v3130_v0  ;;  %v2928_v37 = vpack.c.bf16 %v1326_v34, %v1325_v33 }
 0x2e1   :  { %2881 = vmatpush3.bf16.msra.mxu0 %v2880_v36  ;;  %v1238_v36 = vld [vmem:[#allocation2 + $0x520] sm:$0xff] }
 0x2e2   :  { %2882 = vmatprep.subr.bf16.mxu0 %v3130_v0  ;;  %v2907_v40 = vpack.c.bf16 %v1239_v14, %v1238_v36 }
 0x2e3   :  { %2860 = vmatpush3.bf16.msra.mxu1 %v2859_v38  ;;  %v1327_v38 = vld [vmem:[#allocation2 + $0x5a0] sm:$0xff] }
 0x2e4   :  { %2861 = vmatprep.subr.bf16.mxu1 %v3130_v0  ;;  %v2931_v44 = vpack.c.bf16 %v1328_v39, %v1327_v38 }
 0x2e5   :  { %2884 = vmatpush3.bf16.msra.mxu0 %v2883_v41  ;;  %v1240_v41 = vld [vmem:[#allocation2 + $0x530] sm:$0xff] }
 0x2e6   :  { %2885 = vmatprep.subr.bf16.mxu0 %v3130_v0  ;;  %v2910_v52 = vpack.c.bf16 %v1241_v42, %v1240_v41  ;;  %v1582_v41 = vld [vmem:[#allocation5 + $0x28] sm:$0xff] }
 0x2e7   :  { %2863 = vmatpush3.bf16.msra.mxu1 %v2862_v48  ;;  %v1329_v48 = vld [vmem:[#allocation2 + $0x5b0] sm:$0xff] }
 0x2e8   :  { %2864 = vmatprep.subr.bf16.mxu1 %v3130_v0  ;;  %v2934_v56 = vpack.c.bf16 %v1330_v49, %v1329_v48  ;;  %v1588_v48 = vld [vmem:[#allocation5 + $0x58] sm:$0xff] }
 0x2e9   :  { %2887 = vmatpush3.bf16.msra.mxu0 %v2886_v53  ;;  %v1242_v53 = vld [vmem:[#allocation2 + $0x540] sm:$0xff] }
 0x2ea   :  { %2888 = vmatprep.subr.bf16.mxu0 %v3130_v0  ;;  %v2913_v60 = vpack.c.bf16 %v1243_v55, %v1242_v53  ;;  %v1594_v53 = vld [vmem:[#allocation5 + $0x88] sm:$0xff] }
 0x2eb   :  { %2866 = vmatpush3.bf16.msra.mxu1 %v2865_v58  ;;  %v1331_v58 = vld [vmem:[#allocation2 + $0x5c0] sm:$0xff] }
 0x2ec   :  { %2867 = vmatprep.subr.bf16.mxu1 %v3130_v0  ;;  %v2937_v3 = vpack.c.bf16 %v1332_v59, %v1331_v58  ;;  %v1600_v58 = vld [vmem:[#allocation5 + $0xb8] sm:$0xff] }
 0x2ed   :  { %2890 = vmatpush3.bf16.msra.mxu0 %v2889_v62  ;;  %v1244_v62 = vld [vmem:[#allocation2 + $0x550] sm:$0xff] }
 0x2ee   :  { %2891 = vmatprep.subr.bf16.mxu0 %v3130_v0  ;;  %v2916_v7 = vpack.c.bf16 %v1245_v63, %v1244_v62  ;;  %v1606_v62 = vld [vmem:[#allocation5 + $0xe8] sm:$0xff] }
 0x2ef   :  { %2869 = vmatpush3.bf16.msra.mxu1 %v2868_v4  ;;  %v1333_v4 = vld [vmem:[#allocation2 + $0x5d0] sm:$0xff] }
 0x2f0   :  { %2870 = vmatprep.subr.bf16.mxu1 %v3130_v0  ;;  %v2940_v12 = vpack.c.bf16 %v1334_v5, %v1333_v4  ;;  %v1612_v4 = vld [vmem:[#allocation5 + $0x118] sm:$0xff] }
 0x2f1   :  { %2893 = vmatpush3.bf16.msra.mxu0 %v2892_v8  ;;  %v1246_v8 = vld [vmem:[#allocation2 + $0x560] sm:$0xff] }
 0x2f2   :  { %2894 = vmatprep.subr.bf16.mxu0 %v3130_v0  ;;  %v2919_v17 = vpack.c.bf16 %v1247_v10, %v1246_v8 }
 0x2f3   :  { %2872 = vmatpush3.bf16.msra.mxu1 %v2871_v13  ;;  %v1335_v13 = vld [vmem:[#allocation2 + $0x5e0] sm:$0xff] }
 0x2f4   :  { %2873 = vmatprep.subr.bf16.mxu1 %v3130_v0  ;;  %v2943_v21 = vpack.c.bf16 %v1336_v15, %v1335_v13 }
 0x2f5   :  { %2896 = vmatpush3.bf16.msra.mxu0 %v2895_v18  ;;  %v1248_v18 = vld [vmem:[#allocation2 + $0x570] sm:$0xff] }
 0x2f6   :  { %2897 = vmatprep.subr.bf16.mxu0 %v3130_v0  ;;  %v2922_v24 = vpack.c.bf16 %v1249_v19, %v1248_v18  ;;  %v1615_v18 = vld [vmem:[#allocation5 + $0x130] sm:$0xff]  ;;  %v1618_v19 = vld [vmem:[#allocation5 + $0x148] sm:$0xff] }
 0x2f7   :  { %2875 = vmatpush3.bf16.msra.mxu1 %v2874_v22  ;;  %v1337_v22 = vld [vmem:[#allocation2 + $0x5f0] sm:$0xff] }
 0x2f8   :  { %2900 = vmatprep.subr.bf16.mxu1 %v3130_v0 }
 0x2f9   :  { %2899 = vmatpush3.bf16.msra.mxu0 %v2898_v25  ;;  %v2946_v25 = vpack.c.bf16 %v1338_v23, %v1337_v22  ;;  %v1621_v23 = vld [vmem:[#allocation5 + $0x160] sm:$0xff] }
 0x2fa   :  { %2467 = vmatmul.mubr.f32.vlgmr.msra.gmra.mrb[10].mxu1 %v3365_v11  ;;  %2924 = vmatprep.subr.bf16.mxu0 %v3130_v0 }
 0x2fb   :  { %2902 = vmatpush3.bf16.msra.mxu1 %v2901_v28  ;;  %2536 = vmatprep.mubr.msk.f32.mxu1 %vm3131_vm0, %v3132_v1 }
 0x2fc   :  { %2502 = vmatmul.mubr.f32.vlgmr.msra.gmra.mrb[18].mxu0 %v1161_v32  ;;  %2903 = vmatprep.subr.bf16.mxu1 %v3130_v0 }
 0x2fd   :  { %2926 = vmatpush3.bf16.msra.mxu0 %v2925_v31  ;;  %2571 = vmatprep.mubr.msk.f32.mxu0 %vm3131_vm0, %v3132_v1 }
 0x2fe   :  { %2927 = vmatprep.subr.bf16.mxu0 %v3130_v0 }
 0x2ff   :  { %2905 = vmatpush3.bf16.msra.mxu1 %v2904_v35 }
 0x300   :  { %2906 = vmatprep.subr.bf16.mxu1 %v3130_v0 }
 0x301   :  { %2929 = vmatpush3.bf16.msra.mxu0 %v2928_v37 }
 0x302   :  { %2930 = vmatprep.subr.bf16.mxu0 %v3130_v0 }
 0x303   :  { %2908 = vmatpush3.bf16.msra.mxu1 %v2907_v40  ;;  %v1579_v40 = vld [vmem:[#allocation5 + $0x10] sm:$0xff] }
 0x304   :  { %2909 = vmatprep.subr.bf16.mxu1 %v3130_v0  ;;  %v2985_v42 = vpack.c.bf16 %v1582_v41, %v1579_v40 }
 0x305   :  { %2932 = vmatpush3.bf16.msra.mxu0 %v2931_v44  ;;  %v1585_v44 = vld [vmem:[#allocation5 + $0x40] sm:$0xff] }
 0x306   :  { %2933 = vmatprep.subr.bf16.mxu0 %v3130_v0  ;;  %v2988_v49 = vpack.c.bf16 %v1588_v48, %v1585_v44  ;;  %v1581_v44 = vld [vmem:[#allocation5 + $0x20] sm:$0xff] }
 0x307   :  { %2911 = vmatpush3.bf16.msra.mxu1 %v2910_v52  ;;  %v1591_v52 = vld [vmem:[#allocation5 + $0x70] sm:$0xff] }
 0x308   :  { %2912 = vmatprep.subr.bf16.mxu1 %v3130_v0  ;;  %v2991_v55 = vpack.c.bf16 %v1594_v53, %v1591_v52 }
 0x309   :  { %2935 = vmatpush3.bf16.msra.mxu0 %v2934_v56  ;;  %v1597_v56 = vld [vmem:[#allocation5 + $0xa0] sm:$0xff] }
 0x30a   :  { %2936 = vmatprep.subr.bf16.mxu0 %v3130_v0  ;;  %v2994_v59 = vpack.c.bf16 %v1600_v58, %v1597_v56  ;;  %v1577_v56 = vld [vmem:[#allocation5] sm:$0xff]  ;;  %v1580_v58 = vld [vmem:[#allocation5 + $0x18] sm:$0xff] }
 0x30b   :  { %2914 = vmatpush3.bf16.msra.mxu1 %v2913_v60  ;;  %v1603_v60 = vld [vmem:[#allocation5 + $0xd0] sm:$0xff] }
 0x30c   :  { %2915 = vmatprep.subr.bf16.mxu1 %v3130_v0  ;;  %v2997_v63 = vpack.c.bf16 %v1606_v62, %v1603_v60  ;;  %v1584_v60 = vld [vmem:[#allocation5 + $0x38] sm:$0xff]  ;;  %v1587_v62 = vld [vmem:[#allocation5 + $0x50] sm:$0xff] }
 0x30d   :  { %2938 = vmatpush3.bf16.msra.mxu0 %v2937_v3  ;;  %v1609_v3 = vld [vmem:[#allocation5 + $0x100] sm:$0xff] }
 0x30e   :  { %2939 = vmatprep.subr.bf16.mxu0 %v3130_v0 }
 0x30f   :  { %2917 = vmatpush3.bf16.msra.mxu1 %v2916_v7  ;;  %v3000_v7 = vpack.c.bf16 %v1612_v4, %v1609_v3  ;;  %v2956_v3 = vpack.c.bf16 %v1587_v62, %v1584_v60  ;;  %v1583_v4 = vld [vmem:[#allocation5 + $0x30] sm:$0xff] }
 0x310   :  { %2918 = vmatprep.subr.bf16.mxu1 %v3130_v0 }
 0x311   :  { %2941 = vmatpush3.bf16.msra.mxu0 %v2940_v12 }
 0x312   :  { %2942 = vmatprep.subr.bf16.mxu0 %v3130_v0 }
 0x313   :  { %2920 = vmatpush3.bf16.msra.mxu1 %v2919_v17 }
 0x314   :  { %2921 = vmatprep.subr.bf16.mxu1 %v3130_v0 }
 0x315   :  { %2944 = vmatpush3.bf16.msra.mxu0 %v2943_v21  ;;  %v3003_v21 = vpack.c.bf16 %v1618_v19, %v1615_v18  ;;  %v1599_v18 = vld [vmem:[#allocation5 + $0xb0] sm:$0xff] }
 0x316   :  { %2945 = vmatprep.subr.bf16.mxu0 %v3130_v0  ;;  %v1595_v19 = vld [vmem:[#allocation5 + $0x90] sm:$0xff] }
 0x317   :  { %2923 = vmatpush3.bf16.msra.mxu1 %v2922_v24  ;;  %v1624_v24 = vld [vmem:[#allocation5 + $0x178] sm:$0xff] }
 0x318   :  { %2948 = vmatprep.subr.bf16.mxu1 %v3130_v0 }
 0x319   :  { %2947 = vmatpush3.bf16.msra.mxu0 %v2946_v25  ;;  %v3006_v25 = vpack.c.bf16 %v1624_v24, %v1621_v23  ;;  %v1605_v23 = vld [vmem:[#allocation5 + $0xe0] sm:$0xff]  ;;  %v1604_v24 = vld [vmem:[#allocation5 + $0xd8] sm:$0xff] }
 0x31a   :  { %2537 = vmatmul.mubr.f32.vlgmr.msra.gmra.mrb[12].mxu1 %v1250_v26  ;;  %2984 = vmatprep.subr.bf16.mxu0 %v3130_v0  ;;  %v3499_v26 = vld [vmem:[%s3587_s1] sm:$0x1] }
 0x31b   :  { %2578 = vmatprep.mubr.msk.f32.mxu1 %vm3131_vm0, %v3132_v1 }
 0x31c   :  { %2572 = vmatmul.mubr.f32.vlgmr.msra.gmra.mrb[20].mxu0 %v1339_v27 }
 0x31d   :  { %2625 = vmatprep.mubr.msk.f32.mxu0 %vm3131_vm0, %v3132_v1  ;;  %2986 = vmatpush3.bf16.msra.mxu0 %v2985_v42  ;;  %v1578_v42 = vld [vmem:[#allocation5 + $0x8] sm:$0xff] }
 0x31e   :  { %2987 = vmatprep.subr.bf16.mxu0 %v3130_v0 }
 0x321   :  { %2989 = vmatpush3.bf16.msra.mxu0 %v2988_v49 }
 0x322   :  { %2990 = vmatprep.subr.bf16.mxu0 %v3130_v0 }
 0x325   :  { %2992 = vmatpush3.bf16.msra.mxu0 %v2991_v55  ;;  %v2952_v55 = vpack.c.bf16 %v1581_v44, %v1578_v42  ;;  %v3023_v42 = vld [vmem:[%s3586_s0 + $0x8] sm:$0xff] }
 0x326   :  { %2993 = vmatprep.subr.bf16.mxu0 %v3130_v0 }
 0x329   :  { %2995 = vmatpush3.bf16.msra.mxu0 %v2994_v59 }
 0x32a   :  { %2996 = vmatprep.subr.bf16.mxu0 %v3130_v0 }
 0x32d   :  { %2998 = vmatpush3.bf16.msra.mxu0 %v2997_v63  ;;  %v2954_v63 = vpack.c.bf16 %v1580_v58, %v1577_v56 }
 0x32e   :  { %2999 = vmatprep.subr.bf16.mxu0 %v3130_v0 }
 0x331   :  { %3001 = vmatpush3.bf16.msra.mxu0 %v3000_v7  ;;  %v1590_v7 = vld [vmem:[#allocation5 + $0x68] sm:$0xff] }
 0x332   :  { %3002 = vmatprep.subr.bf16.mxu0 %v3130_v0 }
 0x335   :  { %3004 = vmatpush3.bf16.msra.mxu0 %v3003_v21  ;;  %v1598_v21 = vld [vmem:[#allocation5 + $0xa8] sm:$0xff] }
 0x336   :  { %3005 = vmatprep.subr.bf16.mxu0 %v3130_v0  ;;  %v2966_v45 = vpack.c.bf16 %v1598_v21, %v1595_v19 }
 0x339   :  { %3007 = vmatpush3.bf16.msra.mxu0 %v3006_v25  ;;  %v1608_v25 = vld [vmem:[#allocation5 + $0xf8] sm:$0xff] }
 0x33c   :  { %2626 = vmatmul.mubr.f32.vlgmr.msra.gmra.mrb[22].mxu0 %v3499_v26 }
 0x34d   :  { %v428_v28 = vpop.f32.mrb[2].mxu1 }
 0x34e   :  { %v2188_v29 = vpop.f32.mrb[3].mxu1 }
 0x34f   :  { %v518_v30 = vpop.f32.mrb[10].mxu0 }
 0x350   :  { %v1412_v31 = vrot.slane %v518_v30, 7  ;;  %v2223_v32 = vpop.f32.mrb[11].mxu0 }
 0x352   :  { %v1442_v33 = vsel %vm1441_vm9, %v428_v28, %v1412_v31 }
 0x36d   :  { %v607_v34 = vpop.f32.mrb[4].mxu1 }
 0x36e   :  { %v1415_v11 = vrot.slane %v607_v34, 6  ;;  %v2258_v35 = vpop.f32.mrb[5].mxu1 }
 0x36f   :  { %v696_v36 = vpop.f32.mrb[12].mxu0 }
 0x370   :  { %v1444_v14 = vsel %vm1443_vm10, %v1442_v33, %v1415_v11  ;;  %v1418_v37 = vrot.slane %v696_v36, 5  ;;  %v2293_v38 = vpop.f32.mrb[13].mxu0 }
 0x372   :  { %v1446_v39 = vsel %vm1445_vm11, %v1444_v14, %v1418_v37 }
 0x38d   :  { %v785_v5 = vpop.f32.mrb[6].mxu1 }
 0x38e   :  { %v1421_v8 = vrot.slane %v785_v5, 4  ;;  %v2328_v10 = vpop.f32.mrb[7].mxu1  ;;  %v1586_v5 = vld [vmem:[#allocation5 + $0x48] sm:$0xff] }
 0x38f   :  { %v874_v12 = vpop.f32.mrb[14].mxu0  ;;  %v2958_v10 = vpack.c.bf16 %v1586_v5, %v1583_v4  ;;  %v3026_v4 = vld [vmem:[%s3586_s0 + $0x20] sm:$0xff] }
 0x390   :  { %v1448_v13 = vsel %vm1447_vm12, %v1446_v39, %v1421_v8  ;;  %v1424_v15 = vrot.slane %v874_v12, 3  ;;  %v2363_v17 = vpop.f32.mrb[15].mxu0  ;;  %v1593_v8 = vld [vmem:[#allocation5 + $0x80] sm:$0xff] }
 0x391   :  { %v2960_v12 = vpack.c.bf16 %v1593_v8, %v1590_v7  ;;  %v1596_v17 = vld [vmem:[#allocation5 + $0x98] sm:$0xff] }
 0x392   :  { %v1450_v22 = vsel %vm1449_vm13, %v1448_v13, %v1424_v15  ;;  %v1589_v13 = vld [vmem:[#allocation5 + $0x60] sm:$0xff]  ;;  %v1592_v15 = vld [vmem:[#allocation5 + $0x78] sm:$0xff] }
 0x393   :  { %v2962_v46 = vpack.c.bf16 %v1592_v15, %v1589_v13 }
 0x3ad   :  { %v963_v27 = vpop.f32.mrb[8].mxu1 }
 0x3ae   :  { %v1427_v28 = vrot.slane %v963_v27, 2  ;;  %v2398_v29 = vpop.f32.mrb[9].mxu1  ;;  %v1611_v27 = vld [vmem:[#allocation5 + $0x110] sm:$0xff] }
 0x3af   :  { %v1052_v30 = vpop.f32.mrb[16].mxu0  ;;  %v1610_v29 = vld [vmem:[#allocation5 + $0x108] sm:$0xff] }
 0x3b0   :  { %v1452_v31 = vsel %vm1451_vm14, %v1450_v22, %v1427_v28  ;;  %v1430_v32 = vrot.slane %v1052_v30, 1  ;;  %v2433_v0 = vpop.f32.mrb[17].mxu0  ;;  %v1602_v22 = vld [vmem:[#allocation5 + $0xc8] sm:$0xff]  ;;  %v1607_v28 = vld [vmem:[#allocation5 + $0xf0] sm:$0xff] }
 0x3b1   :  { %v2968_v50 = vpack.c.bf16 %v1605_v23, %v1602_v22  ;;  %v1614_v30 = vld [vmem:[#allocation5 + $0x128] sm:$0xff]  ;;  %v2974_v61 = vpack.c.bf16 %v1610_v29, %v1607_v28  ;;  %v1616_v0 = vld [vmem:[#allocation5 + $0x138] sm:$0xff] }
 0x3b2   :  { %v1454_v33 = vsel %vm1453_vm15, %v1452_v31, %v1430_v32  ;;  %v1617_v31 = vld [vmem:[#allocation5 + $0x140] sm:$0xff] }
 0x3b3   :  { %v1613_v32 = vld [vmem:[#allocation5 + $0x120] sm:$0xff] }
 0x3cd   :  { %v1139_v34 = vpop.f32.mrb[10].mxu1 }
 0x3ce   :  { %v2468_v11 = vpop.f32.mrb[11].mxu1 }
 0x3cf   :  { %v1229_v35 = vpop.f32.mrb[18].mxu0  ;;  %v2978_v11 = vpack.c.bf16 %v1616_v0, %v1613_v32 }
 0x3d0   :  { %v1433_v36 = vrot.slane %v1229_v35, 7  ;;  %v2503_v14 = vpop.f32.mrb[19].mxu0 }
 0x3d2   :  { %v1455_v37 = vsel %vm1441_vm9, %v1139_v34, %v1433_v36  ;;  %v1623_v34 = vld [vmem:[#allocation5 + $0x170] sm:$0xff] }
 0x3d3   :  { %v1619_v36 = vld [vmem:[#allocation5 + $0x150] sm:$0xff] }
 0x3d4   :  { %v2982_v6 = vpack.c.bf16 %v1622_v43, %v1619_v36 }
 0x3ed   :  { %v1318_v38 = vpop.f32.mrb[12].mxu1 }
 0x3ee   :  { %v1436_v39 = vrot.slane %v1318_v38, 6  ;;  %v2538_v40 = vpop.f32.mrb[13].mxu1 }
 0x3ef   :  { %v1407_v41 = vpop.f32.mrb[20].mxu0 }
 0x3f0   :  { %v1456_v48 = vsel %vm1443_vm10, %v1455_v37, %v1436_v39  ;;  %v1439_v49 = vrot.slane %v1407_v41, 5  ;;  %v2573_v52 = vpop.f32.mrb[21].mxu0  ;;  %v3022_v37 = vld [vmem:[%s3586_s0] sm:$0xff] }
 0x3f1   :  { %v3024_v52 = vld [vmem:[%s3586_s0 + $0x10] sm:$0xff] }
 0x3f2   :  { %v1457_v53 = vsel %vm1445_vm11, %v1456_v48, %v1439_v49 }
 0x3f3   :  { %v2949_v59 = vpack.c.bf16 %v1457_v53, %v1454_v33  ;;  %v1620_v33 = vld [vmem:[#allocation5 + $0x158] sm:$0xff] }
 0x3f4   :  { %v2980_v35 = vpack.c.bf16 %v1623_v34, %v1620_v33 }
 0x3f5   :  { %2951 = vmatpush3.bf16.msk.msra.mxu1 %vm2950_vm1, %v2949_v59  ;;  %v3025_v59 = vld [vmem:[%s3586_s0 + $0x18] sm:$0xff] }
 0x3f6   :  { %2953 = vmatprep.subr.bf16.mxu1 %v2952_v55 }
 0x3f8   :  { %2579 = vmatmul.mubr.msk.f32.vlgmr.msra.gmra.mrb[14].mxu1 %vm1458_vm2, %v227_v47  ;;  %v2964_v47 = vpack.c.bf16 %v1599_v18, %v1596_v17 }
 0x3f9   :  { %2955 = vmatpush1.bf16.msra.mxu1 %v2954_v63  ;;  %2581 = vmatprep.mubr.msk.f32.mxu1 %vm3131_vm0, %v3132_v1 }
 0x3fa   :  { %2957 = vmatprep.subr.bf16.mxu1 %v2956_v3 }
 0x3fc   :  { %2582 = vmatmul.mubr.msk.f32.gmra.mrb[16].mxu1 %vm1458_vm2, %v228_v51  ;;  %v1601_v51 = vld [vmem:[#allocation5 + $0xc0] sm:$0xff] }
 0x3fd   :  { %2959 = vmatpush1.bf16.msra.mxu1 %v2958_v10  ;;  %2584 = vmatprep.mubr.msk.f32.mxu1 %vm3131_vm0, %v3132_v1  ;;  %v2970_v54 = vpack.c.bf16 %v1604_v24, %v1601_v51  ;;  %v3135_v10 = vmov 1966171168  }
 0x3fe   :  { %2961 = vmatprep.subr.bf16.mxu1 %v2960_v12  ;;  %v1771_v12 = vunpack.c.l.s4 %v3135_v10 }
 0x400   :  { %2585 = vmatmul.mubr.msk.f32.gmra.mrb[18].mxu1 %vm1458_vm2, %v229_v57  ;;  %v2972_v57 = vpack.c.bf16 %v1611_v27, %v1608_v25 }
 0x401   :  { %2963 = vmatpush1.bf16.msra.mxu1 %v2962_v46  ;;  %2587 = vmatprep.mubr.msk.f32.mxu1 %vm3131_vm0, %v3132_v1 }
 0x402   :  { %2965 = vmatprep.subr.bf16.mxu1 %v2964_v47 }
 0x404   :  { %2588 = vmatmul.mubr.msk.f32.gmra.mrb[20].mxu1 %vm1458_vm2, %v230_v2  ;;  %v2976_v2 = vpack.c.bf16 %v1617_v31, %v1614_v30 }
 0x405   :  { %2967 = vmatpush1.bf16.msra.mxu1 %v2966_v45  ;;  %2590 = vmatprep.mubr.msk.f32.mxu1 %vm3131_vm0, %v3132_v1 }
 0x406   :  { %2969 = vmatprep.subr.bf16.mxu1 %v2968_v50 }
 0x408   :  { %2591 = vmatmul.mubr.msk.f32.gmra.mrb[22].mxu1 %vm1458_vm2, %v231_v9 }
 0x409   :  { %2971 = vmatpush1.bf16.msra.mxu1 %v2970_v54  ;;  %1689 = vmatprep.mubr.f32.mxu1 %v3132_v1 }
 0x40a   :  { %2973 = vmatprep.subr.bf16.mxu1 %v2972_v57 }
 0x40d   :  { %2975 = vmatpush1.bf16.msra.mxu1 %v2974_v61 }
 0x40e   :  { %2977 = vmatprep.subr.bf16.mxu1 %v2976_v2 }
 0x40f   :  { %v1762_v9 = vpop.f32.mrb[22].mxu0 }
 0x410   :  { %v2627_v1 = vpop.f32.mrb[23].mxu0 }
 0x411   :  { %2979 = vmatpush1.bf16.msra.mxu1 %v2978_v11 }
 0x412   :  { %2981 = vmatprep.subr.bf16.mxu1 %v2980_v35 }
 0x415   :  { %2983 = vmatpush1.bf16.msra.mxu1 %v2982_v6 }
 0x418   :  { %1690 = vmatmul.mubr.f32.vlgmr.msra.gmra.mrb[24].mxu1 %v3499_v26 }
 0x4cb   :  { %v1543_v14 = vpop.f32.mrb[14].mxu1 }
 0x4cc   :  { %v1544_v38 = vadd.f32 %v3022_v37, %v1543_v14  ;;  %v2580_v39 = vpop.f32.mrb[15].mxu1 }
 0x4ce   :  { %v1567_v40 = vmul.f32 0.5, %v1544_v38 }
 0x4cf   :  { %v1548_v41 = vpop.f32.mrb[16].mxu1 }
 0x4d0   :  { %1572 = vst [vmem:[#allocation7] sm:$0xff] %v1567_v40  ;;  %v1549_v44 = vadd.f32 %v3023_v42, %v1548_v41  ;;  %v2583_v48 = vpop.f32.mrb[17].mxu1 }
 0x4d2   :  { %v1568_v49 = vmul.f32 0.5, %v1549_v44 }
 0x4d3   :  { %v1553_v26 = vpop.f32.mrb[18].mxu1 }
 0x4d4   :  { %1573 = vst [vmem:[#allocation7 + $0x8] sm:$0xff] %v1568_v49  ;;  %v1554_v53 = vadd.f32 %v3024_v52, %v1553_v26  ;;  %v2586_v55 = vpop.f32.mrb[19].mxu1 }
 0x4d6   :  { %v1569_v56 = vmul.f32 0.5, %v1554_v53 }
 0x4d7   :  { %v1558_v58 = vpop.f32.mrb[20].mxu1 }
 0x4d8   :  { %1574 = vst [vmem:[#allocation7 + $0x10] sm:$0xff] %v1569_v56  ;;  %v1559_v60 = vadd.f32 %v3025_v59, %v1558_v58  ;;  %v2589_v62 = vpop.f32.mrb[21].mxu1 }
 0x4da   :  { %v1570_v63 = vmul.f32 0.5, %v1559_v60 }
 0x4db   :  { %v1563_v3 = vpop.f32.mrb[22].mxu1 }
 0x4dc   :  { %1575 = vst [vmem:[#allocation7 + $0x18] sm:$0xff] %v1570_v63  ;;  %v1564_v5 = vadd.f32 %v3026_v4, %v1563_v3  ;;  %v2592_v7 = vpop.f32.mrb[23].mxu1 }
 0x4de   :  { %v1571_v8 = vmul.f32 0.5, %v1564_v5 }
 0x4e0   :  { %1576 = vst [vmem:[#allocation7 + $0x20] sm:$0xff] %v1571_v8 }
 0x4e1   :  { %3083 = shalt.err (!%p3080_p6)
}
 0x4e2   :  { %s3084_s12 = scalar_lea.hbm %s3591_s5, 640 }
 0x4e3   :  { %p3085_p7 = scmp.ne.s32.totalorder %s3591_s5, %s3084_s12  ;;  %p3088_p8 = scmp.lt.u32.totalorder %s3084_s12, %s3591_s5 }
 0x4e5   :  { %p3090_p9 = pnand %p3088_p8, %p3085_p7 }
 0x4e7   :  { %3093 = shalt.err (!%p3090_p9)
}
 0x4e8   :  { %1809 = dma.vmem_to_hbm [thread:$0]  %s1804_s28, 640, %s3591_s5, [#allocation4], %s3125_s7, %s3125_s7, %s3126_s8   ;;  %v1772_v13 = vunpack.c.0.s8 %v1771_v12  ;;  %vm1795_vm0 = vcmp.lt.s32.totalorder %v59_v16, 384 }
 0x4e9   :  { %s3136_s17 = smov [#allocation8]  }
 0x4ea   :  { %v1775_v15 = vsub.s32 %v1772_v13, %v3243_v20  ;;  %s1816_s18 = sshll.u32 %s3136_s17, 4  ;;  %s1817_s18 = int_to_ptr.vmem [resolvable:$true] %s1816_s18 }
 0x4eb   :  { %v1691_v17 = vpop.f32.mrb[24].mxu1  ;;  %s3094_s19 = scalar_lea.vmem %s1817_s18, 48  ;;  %s3098_s20 = scalar_lea.vmem %s1817_s18, 64 }
 0x4ec   :  { %v1693_v18 = vpop.f32.mrb[25].mxu1  ;;  %v1783_v47 = vrot.slane %v1762_v9, %v1775_v15  ;;  %p3095_p10 = scmp.ne.s32.totalorder %s1817_s18, %s3094_s19  ;;  %p3099_p11 = scmp.lt.s32.totalorder %s1817_s18, %s1817_s18 }
 0x4ed   :  { %v1769_v46 = vcombine.low %v1691_v17, %v1693_v18  ;;  %p3100_p12 = scmp.lt.s32.totalorder %s3098_s20, %s3094_s19 }
 0x4ef   :  { %v1776_v19 = vrot.slane %v1769_v46, %v1775_v15  ;;  %p3101_p13 = por %p3100_p12, %p3099_p11 }
 0x4f1   :  { %v1784_v21 = vcombine.low %v1776_v19, %v1783_v47  ;;  %p3102_p0 = pnand %p3101_p13, %p3095_p10 }
 0x4f3   :  { %v1791_v22 = vrot.slane %v1784_v21, %v1775_v15 }
 0x4f5   :  { %1797 = vst.msk [vmem:[#allocation8] sm:$0x7] %vm1795_vm0, %v1791_v22 }
 0x4f6   :  { %3105 = shalt.err (!%p3102_p0)
}
 0x4f7   :  { %s3106_s8 = scalar_lea.hbm %s3592_s6, 48 }
 0x4f8   :  { %p3107_p1 = scmp.ne.s32.totalorder %s3592_s6, %s3106_s8  ;;  %p3110_p2 = scmp.lt.u32.totalorder %s3106_s8, %s3592_s6 }
 0x4fa   :  { %p3112_p3 = pnand %p3110_p2, %p3107_p1 }
 0x4fc   :  { %3115 = shalt.err (!%p3112_p3)
}
 0x4fd   :  { %1819 = dma.vmem_to_hbm [thread:$0]  %s1817_s18, 48, %s3592_s6, [#allocation9]  }
 0x4fe   :  { %3120 = dma.done.wait [#allocation4], 640  }
 0x4ff   :  { %3121 = vsyncadd [#allocation4], 4294966656 }
 0x500   :  { %3122 = dma.done.wait [#allocation9], 48  }
 0x501   :  { %3123 = vsyncadd [#allocation9], 4294967248 }
 0x502   :  { %1826 = vsyncpa [#allocation3], 1 }
 0x503   :  { %1827 = vsyncpa [#allocation6], 1 }
 0x504   :  { %1828 = vsyncpa [#allocation4], 1 }
 0x505   :  { %1829 = vsyncpa [#allocation9], 1 }

</bundles_post_ra>
